<compile_context>
chip_gen: v7x
topology: tpu7x:2x2x1
jax: 0.10.0
libtpu: 0.0.40
codegen_flags: <defaults>
</compile_context>

<pallas_src>
import jax
import jax.numpy as jnp
import numpy as np
from jax import lax
from jax.experimental import pallas as pl
from jax.experimental.pallas import tpu as pltpu

LANE = 128


# ----------------------------------------------------------------------------
# Helpers
# ----------------------------------------------------------------------------
def _round_up(x, m):
    return (x + m - 1) // m * m


def _vmem_capacity_bytes():
    """Physical VMEM per TensorCore (128 MiB v5e/v6e, 64 MiB v7x)."""
    try:
        cap = getattr(pltpu.get_tpu_info(), "vmem_capacity_bytes", None)
        if cap:
            return int(cap)
    except Exception:
        pass
    return 64 << 20  # conservative fallback (v7x-sized)


def fold_bn(w_oihw, conv_b, gamma, beta, mean, var, eps=1e-5):
    scale = gamma / jnp.sqrt(var + eps)                  # (Cout,)
    w = w_oihw * scale[:, None, None, None]
    b = (conv_b - mean) * scale + beta
    return w, b


# ----------------------------------------------------------------------------
# Pallas kernel: one batch element per grid step, full H x W tile in VMEM.
# ----------------------------------------------------------------------------
def block_kernel(x_ref, w1_ref, b1_ref, w2_ref, b2_ref, w3_ref, b3_ref, o_ref):
    _, H, W, Cin = x_ref.shape
    C1 = w1_ref.shape[1]
    C2 = w3_ref.shape[1]
    HW = H * W

    # --- conv1x1 (folded BN) + ReLU: (HW, Cin) @ (Cin, C1) -------------------
    x_bf = x_ref[...].reshape(HW, Cin).astype(jnp.bfloat16)
    h1 = jnp.dot(x_bf, w1_ref[...], preferred_element_type=jnp.float32)
    h1 = jnp.maximum(h1 + b1_ref[...], 0.0)              # f32 (HW, C1)

    # --- conv3x3, stride=1, pad=1 (folded BN) + ReLU -------------------------
    # Build a (HW, 9*C1) bf16 tap matrix (9 shifted+masked views of h1) and do
    # a single MXU contraction against the (9*C1, C1) weight slab: K is
    # accumulated inside the MXU (no chained f32 add passes, no per-tap drain).
    yy = lax.broadcasted_iota(jnp.int32, (H, W, 1), 0).reshape(HW, 1)
    xx = lax.broadcasted_iota(jnp.int32, (H, W, 1), 1).reshape(HW, 1)
    # Boundary masks hoisted out of the tap loop (4 compares total).
    y_ok = {-1: yy >= 1, 0: None, 1: yy <= H - 2}
    x_ok = {-1: xx >= 1, 0: None, 1: xx <= W - 2}

    taps = []
    for ky in (-1, 0, 1):
        for kx in (-1, 0, 1):
            if ky == 0 and kx == 0:
                taps.append(h1.astype(jnp.bfloat16))
                continue
            d = ky * W + kx                               # want tap[r] = h1[r + d]
            # pltpu.roll uses the jnp.roll convention: out[i] = x[(i - s) % n].
            shifted = pltpu.roll(h1, (-d) % HW, 0)        # 32-bit XLU rotation
            masks = [m for m in (y_ok[ky], x_ok[kx]) if m is not None]
            valid = masks[0] if len(masks) == 1 else (masks[0] & masks[1])
            taps.append(jnp.where(valid, shifted, 0.0).astype(jnp.bfloat16))
    tap_mat = jnp.concatenate(taps, axis=-1)              # (HW, 9*C1) bf16

    h2 = jnp.dot(tap_mat, w2_ref[...], preferred_element_type=jnp.float32)
    h2 = jnp.maximum(h2 + b2_ref[...], 0.0).astype(jnp.bfloat16)

    # --- conv1x1 expansion (folded BN) ---------------------------------------
    h3 = jnp.dot(h2, w3_ref[...], preferred_element_type=jnp.float32) + b3_ref[...]

    # --- residual add + ReLU (identity read late -> short f32 live range) ----
    ident = x_ref[...].reshape(HW, Cin)                   # Cin == C2 (padded)
    out = jnp.maximum(h3 + ident, 0.0)
    o_ref[...] = out.reshape(1, H, W, C2).astype(o_ref.dtype)


# ----------------------------------------------------------------------------
# Wrapper: BN folding, lane-dense channel padding, bf16 weights, pallas_call.
# Interface is NCHW (like the PyTorch module); NHWC is used internally.
# ----------------------------------------------------------------------------
def block_forward(x_nchw, p):
    x_nhwc = jnp.transpose(x_nchw, (0, 2, 3, 1))
    N, H, W, Cin = x_nhwc.shape

    # Fold BN into conv weights/biases (eval mode, running stats).
    w1f, b1f = fold_bn(p["w1"], p["cb1"], p["g1"], p["be1"], p["m1"], p["v1"])
    w2f, b2f = fold_bn(p["w2"], p["cb2"], p["g2"], p["be2"], p["m2"], p["v2"])
    w3f, b3f = fold_bn(p["w3"], p["cb3"], p["g3"], p["be3"], p["m3"], p["v3"])

    C1 = w1f.shape[0]
    C2 = w3f.shape[0]
    assert C2 == Cin, "identity path requires n_in == 4 * n_out (no downsample)"
    assert (H * W) % 8 == 0, "flattened H*W must be a multiple of 8"

    Cin_p, C1_p, C2_p = (_round_up(c, LANE) for c in (Cin, C1, C2))

    def pad2(a, rows, cols):
        return jnp.pad(a, ((0, rows - a.shape[0]), (0, cols - a.shape[1])))

    # MXU-friendly layouts: bf16 weights (half the DMA), f32 biases, 128-padded.
    w1k = pad2(w1f.reshape(C1, Cin).T, Cin_p, C1_p).astype(jnp.bfloat16)
    # conv2 weights: OIHW -> (kh, kw, cin, cout), pad channels, flatten
    # (kh, kw, cin) into K so row-block k = (kh*3 + kw) matches the tap order.
    w2k = jnp.pad(jnp.transpose(w2f, (2, 3, 1, 0)),
                  ((0, 0), (0, 0), (0, C1_p - C1), (0, C1_p - C1)))
    w2k = w2k.reshape(9 * C1_p, C1_p).astype(jnp.bfloat16)
    w3k = pad2(w3f.reshape(C2, C1).T, C1_p, C2_p).astype(jnp.bfloat16)
    b1k = jnp.pad(b1f, (0, C1_p - C1)).reshape(1, C1_p)
    b2k = jnp.pad(b2f, (0, C1_p - C1)).reshape(1, C1_p)
    b3k = jnp.pad(b3f, (0, C2_p - C2)).reshape(1, C2_p)
    x_p = jnp.pad(x_nhwc, ((0, 0), (0, 0), (0, 0), (0, Cin_p - Cin)))

    # VMEM budget: double-buffered x/out blocks + weights + in-kernel
    # temporaries (h1, taps, tap matrix, h2, h3, out).  Cap at 75% of the
    # physical VMEM: ~48 MiB on v7x, up to ~96 MiB on v5e/v6e.
    HW = H * W
    wbytes = ((Cin_p * C1_p + 9 * C1_p * C1_p + C1_p * C2_p) * 2
              + (2 * C1_p + C2_p) * 4)
    blk_bytes = 2 * HW * (Cin_p + C2_p) * 4              # double-buffered x/out
    tmp_bytes = HW * (40 * C1_p + 20 * C2_p)             # f32/bf16 temporaries
    est = blk_bytes + 2 * wbytes + tmp_bytes
    vmem_limit = int(min(max(est + (8 << 20), 32 << 20),
                         int(_vmem_capacity_bytes() * 0.75)))

    flops = 2 * N * HW * (Cin_p * C1_p + 9 * C1_p * C1_p + C1_p * C2_p)
    bytes_accessed = N * HW * (Cin_p + C2_p) * 4 + wbytes

    out_p = pl.pallas_call(
        block_kernel,
        out_shape=jax.ShapeDtypeStruct((N, H, W, C2_p), x_nhwc.dtype),
        grid_spec=pltpu.PrefetchScalarGridSpec(
            num_scalar_prefetch=0,
            grid=(N,),
            in_specs=[
                pl.BlockSpec((1, H, W, Cin_p), lambda n: (n, 0, 0, 0)),
                pl.BlockSpec((Cin_p, C1_p), lambda n: (0, 0)),
                pl.BlockSpec((1, C1_p), lambda n: (0, 0)),
                pl.BlockSpec((9 * C1_p, C1_p), lambda n: (0, 0)),
                pl.BlockSpec((1, C1_p), lambda n: (0, 0)),
                pl.BlockSpec((C1_p, C2_p), lambda n: (0, 0)),
                pl.BlockSpec((1, C2_p), lambda n: (0, 0)),
            ],
            out_specs=pl.BlockSpec((1, H, W, C2_p), lambda n: (n, 0, 0, 0)),
        ),
        compiler_params=pltpu.CompilerParams(
            dimension_semantics=("parallel",),
            vmem_limit_bytes=vmem_limit),
        cost_estimate=pl.CostEstimate(flops=flops, transcendentals=0,
                                      bytes_accessed=bytes_accessed),
    )(x_p, w1k, b1k, w2k, b2k, w3k, b3k)

    return jnp.transpose(out_p[..., :C2], (0, 3, 1, 2))   # back to NCHW


# ----------------------------------------------------------------------------
# Pure-JAX reference (XLA convs, un-folded BN in eval mode), NCHW in/out.
# ----------------------------------------------------------------------------
def reference_block(x_nchw, p, eps=1e-5):
    HIGH = jax.lax.Precision.HIGHEST
    x = jnp.transpose(x_nchw, (0, 2, 3, 1))

    def bn(y, g, b, m, v):
        return g * (y - m) / jnp.sqrt(v + eps) + b

    def conv(h, w_oihw, bias, pad=0):
        w_hwio = jnp.transpose(w_oihw, (2, 3, 1, 0))
        y = lax.conv_general_dilated(
            h, w_hwio, (1, 1), [(pad, pad), (pad, pad)],
            dimension_numbers=("NHWC", "HWIO", "NHWC"), precision=HIGH)
        return y + bias

    h = jax.nn.relu(bn(conv(x, p["w1"], p["cb1"]),
                       p["g1"], p["be1"], p["m1"], p["v1"]))
    h = jax.nn.relu(bn(conv(h, p["w2"], p["cb2"], pad=1),
                       p["g2"], p["be2"], p["m2"], p["v2"]))
    h = bn(conv(h, p["w3"], p["cb3"]), p["g3"], p["be3"], p["m3"], p["v3"])
    return jnp.transpose(jax.nn.relu(h + x), (0, 3, 1, 2))


# ----------------------------------------------------------------------------
# Main
# ----------------------------------------------------------------------------
if __name__ == "__main__":
    key = jax.random.PRNGKey(0)

    N, H, W = 2, 16, 16
    n_out = 4
    expansion = 4
    n_in = n_out * expansion          # 16 -> identity path matches (no downsample)

    keys = jax.random.split(key, 32)
    ki = iter(keys)

    def nrm(shape, scale=0.1):
        return scale * jax.random.normal(next(ki), shape, jnp.float32)

    def bn_params(c):
        return dict(
            g=1.0 + 0.1 * jax.random.normal(next(ki), (c,), jnp.float32),
            be=0.1 * jax.random.normal(next(ki), (c,), jnp.float32),
            m=0.1 * jax.random.normal(next(ki), (c,), jnp.float32),
            v=jax.random.uniform(next(ki), (c,), jnp.float32, 0.5, 1.5),
        )

    bn1, bn2, bn3 = bn_params(n_out), bn_params(n_out), bn_params(n_out * expansion)
    params = dict(
        w1=nrm((n_out, n_in, 1, 1)), cb1=nrm((n_out,)),
        g1=bn1["g"], be1=bn1["be"], m1=bn1["m"], v1=bn1["v"],
        w2=nrm((n_out, n_out, 3, 3)), cb2=nrm((n_out,)),
        g2=bn2["g"], be2=bn2["be"], m2=bn2["m"], v2=bn2["v"],
        w3=nrm((n_out * expansion, n_out, 1, 1)), cb3=nrm((n_out * expansion,)),
        g3=bn3["g"], be3=bn3["be"], m3=bn3["m"], v3=bn3["v"],
    )

    # NCHW input, like the PyTorch module.
    x = jax.random.normal(next(ki), (N, n_in, H, W), jnp.float32)

    out = jax.block_until_ready(block_forward(x, params))
    ref = jax.block_until_ready(reference_block(x, params))

    # bf16 matmul operands (f32 accumulation) vs f32 HIGHEST reference.
    np.testing.assert_allclose(np.asarray(out), np.asarray(ref),
                               rtol=3e-2, atol=3e-2)

    print("KERNEL_OK")
</pallas_src>

<mosaic_0001>
module attributes {stable_mosaic.version = 11 : i64} {
  func.func @block_kernel(%arg0: i32, %arg1: memref<1x16x16x128xf32, #tpu.memory_space<vmem>>, %arg2: memref<128x128xbf16, #tpu.memory_space<vmem>>, %arg3: memref<1x128xf32, #tpu.memory_space<vmem>>, %arg4: memref<1152x128xbf16, #tpu.memory_space<vmem>>, %arg5: memref<1x128xf32, #tpu.memory_space<vmem>>, %arg6: memref<128x128xbf16, #tpu.memory_space<vmem>>, %arg7: memref<1x128xf32, #tpu.memory_space<vmem>>, %arg8: memref<1x16x16x128xf32, #tpu.memory_space<vmem>>) attributes {dimension_semantics = [#tpu.dimension_semantics<parallel>], iteration_bounds = array<i64: 2>, scalar_prefetch = 0 : i64, scratch_operands = 0 : i64, tpu.core_type = #tpu.core_type<tc>, window_params = [{transform_indices = @transform_0, window_bounds = array<i64: 1, 16, 16, 128>}, {pipeline_mode = #tpu.pipeline_mode<synchronous>, transform_indices = @transform_1, window_bounds = array<i64: 128, 128>}, {pipeline_mode = #tpu.pipeline_mode<synchronous>, transform_indices = @transform_2, window_bounds = array<i64: 1, 128>}, {pipeline_mode = #tpu.pipeline_mode<synchronous>, transform_indices = @transform_3, window_bounds = array<i64: 1152, 128>}, {pipeline_mode = #tpu.pipeline_mode<synchronous>, transform_indices = @transform_4, window_bounds = array<i64: 1, 128>}, {pipeline_mode = #tpu.pipeline_mode<synchronous>, transform_indices = @transform_5, window_bounds = array<i64: 128, 128>}, {pipeline_mode = #tpu.pipeline_mode<synchronous>, transform_indices = @transform_6, window_bounds = array<i64: 1, 128>}, {transform_indices = @transform_7, window_bounds = array<i64: 1, 16, 16, 128>}]} {
    %c0 = arith.constant 0 : index
    %c0_0 = arith.constant 0 : index
    %c0_1 = arith.constant 0 : index
    %c0_2 = arith.constant 0 : index
    %0 = vector.load %arg1[%c0, %c0_0, %c0_1, %c0_2] : memref<1x16x16x128xf32, #tpu.memory_space<vmem>>, vector<1x16x16x128xf32>
    %1 = vector.shape_cast %0 : vector<1x16x16x128xf32> to vector<256x128xf32>
    %2 = arith.truncf %1 : vector<256x128xf32> to vector<256x128xbf16>
    %c0_3 = arith.constant 0 : index
    %c0_4 = arith.constant 0 : index
    %3 = vector.load %arg2[%c0_3, %c0_4] : memref<128x128xbf16, #tpu.memory_space<vmem>>, vector<128x128xbf16>
    %cst = arith.constant dense<0.000000e+00> : vector<256x128xf32>
    %4 = tpu.matmul %2, %3, %cst {dimension_numbers = #tpu.dot_dimension_numbers<[1], [0], [0], [1], [0, 0, 1, 1], [], []>} : vector<256x128xbf16>, vector<128x128xbf16>, vector<256x128xf32> -> vector<256x128xf32>
    %c0_5 = arith.constant 0 : index
    %c0_6 = arith.constant 0 : index
    %5 = vector.load %arg3[%c0_5, %c0_6] : memref<1x128xf32, #tpu.memory_space<vmem>>, vector<1x128xf32>
    %6 = vector.broadcast %5 : vector<1x128xf32> to vector<256x128xf32>
    %7 = arith.addf %4, %6 : vector<256x128xf32>
    %cst_7 = arith.constant 0.000000e+00 : f32
    %8 = vector.broadcast %cst_7 : f32 to vector<256x128xf32>
    %9 = arith.maximumf %7, %8 : vector<256x128xf32>
    %10 = tpu.iota {dimensions = array<i32: 0>} : vector<16x16x1xi32>
    %11 = vector.shape_cast %10 : vector<16x16x1xi32> to vector<256x1xi32>
    %12 = tpu.iota {dimensions = array<i32: 1>} : vector<16x16x1xi32>
    %13 = vector.shape_cast %12 : vector<16x16x1xi32> to vector<256x1xi32>
    %c1_i32 = arith.constant 1 : i32
    %14 = vector.broadcast %c1_i32 : i32 to vector<256x1xi32>
    %15 = arith.cmpi sge, %11, %14 : vector<256x1xi32>
    %c14_i32 = arith.constant 14 : i32
    %16 = vector.broadcast %c14_i32 : i32 to vector<256x1xi32>
    %17 = arith.cmpi sle, %11, %16 : vector<256x1xi32>
    %c1_i32_8 = arith.constant 1 : i32
    %18 = vector.broadcast %c1_i32_8 : i32 to vector<256x1xi32>
    %19 = arith.cmpi sge, %13, %18 : vector<256x1xi32>
    %c14_i32_9 = arith.constant 14 : i32
    %20 = vector.broadcast %c14_i32_9 : i32 to vector<256x1xi32>
    %21 = arith.cmpi sle, %13, %20 : vector<256x1xi32>
    %c17_i32 = arith.constant 17 : i32
    %22 = tpu.dynamic_rotate %9 by %c17_i32 dim 0 : vector<256x128xf32>, i32 -> vector<256x128xf32>
    %23 = arith.andi %15, %19 : vector<256x1xi1>
    %cst_10 = arith.constant 0.000000e+00 : f32
    %24 = vector.shape_cast %23 : vector<256x1xi1> to vector<256x1xi1>
    %25 = vector.broadcast %24 : vector<256x1xi1> to vector<256x128xi1>
    %26 = vector.broadcast %cst_10 : f32 to vector<256x128xf32>
    %27 = arith.select %25, %22, %26 : vector<256x128xi1>, vector<256x128xf32>
    %28 = arith.truncf %27 : vector<256x128xf32> to vector<256x128xbf16>
    %c16_i32 = arith.constant 16 : i32
    %29 = tpu.dynamic_rotate %9 by %c16_i32 dim 0 : vector<256x128xf32>, i32 -> vector<256x128xf32>
    %cst_11 = arith.constant 0.000000e+00 : f32
    %30 = vector.shape_cast %15 : vector<256x1xi1> to vector<256x1xi1>
    %31 = vector.broadcast %30 : vector<256x1xi1> to vector<256x128xi1>
    %32 = vector.broadcast %cst_11 : f32 to vector<256x128xf32>
    %33 = arith.select %31, %29, %32 : vector<256x128xi1>, vector<256x128xf32>
    %34 = arith.truncf %33 : vector<256x128xf32> to vector<256x128xbf16>
    %c15_i32 = arith.constant 15 : i32
    %35 = tpu.dynamic_rotate %9 by %c15_i32 dim 0 : vector<256x128xf32>, i32 -> vector<256x128xf32>
    %36 = arith.andi %15, %21 : vector<256x1xi1>
    %cst_12 = arith.constant 0.000000e+00 : f32
    %37 = vector.shape_cast %36 : vector<256x1xi1> to vector<256x1xi1>
    %38 = vector.broadcast %37 : vector<256x1xi1> to vector<256x128xi1>
    %39 = vector.broadcast %cst_12 : f32 to vector<256x128xf32>
    %40 = arith.select %38, %35, %39 : vector<256x128xi1>, vector<256x128xf32>
    %41 = arith.truncf %40 : vector<256x128xf32> to vector<256x128xbf16>
    %c1_i32_13 = arith.constant 1 : i32
    %42 = tpu.dynamic_rotate %9 by %c1_i32_13 dim 0 : vector<256x128xf32>, i32 -> vector<256x128xf32>
    %cst_14 = arith.constant 0.000000e+00 : f32
    %43 = vector.shape_cast %19 : vector<256x1xi1> to vector<256x1xi1>
    %44 = vector.broadcast %43 : vector<256x1xi1> to vector<256x128xi1>
    %45 = vector.broadcast %cst_14 : f32 to vector<256x128xf32>
    %46 = arith.select %44, %42, %45 : vector<256x128xi1>, vector<256x128xf32>
    %47 = arith.truncf %46 : vector<256x128xf32> to vector<256x128xbf16>
    %48 = arith.truncf %9 : vector<256x128xf32> to vector<256x128xbf16>
    %c255_i32 = arith.constant 255 : i32
    %49 = tpu.dynamic_rotate %9 by %c255_i32 dim 0 : vector<256x128xf32>, i32 -> vector<256x128xf32>
    %cst_15 = arith.constant 0.000000e+00 : f32
    %50 = vector.shape_cast %21 : vector<256x1xi1> to vector<256x1xi1>
    %51 = vector.broadcast %50 : vector<256x1xi1> to vector<256x128xi1>
    %52 = vector.broadcast %cst_15 : f32 to vector<256x128xf32>
    %53 = arith.select %51, %49, %52 : vector<256x128xi1>, vector<256x128xf32>
    %54 = arith.truncf %53 : vector<256x128xf32> to vector<256x128xbf16>
    %c241_i32 = arith.constant 241 : i32
    %55 = tpu.dynamic_rotate %9 by %c241_i32 dim 0 : vector<256x128xf32>, i32 -> vector<256x128xf32>
    %56 = arith.andi %17, %19 : vector<256x1xi1>
    %cst_16 = arith.constant 0.000000e+00 : f32
    %57 = vector.shape_cast %56 : vector<256x1xi1> to vector<256x1xi1>
    %58 = vector.broadcast %57 : vector<256x1xi1> to vector<256x128xi1>
    %59 = vector.broadcast %cst_16 : f32 to vector<256x128xf32>
    %60 = arith.select %58, %55, %59 : vector<256x128xi1>, vector<256x128xf32>
    %61 = arith.truncf %60 : vector<256x128xf32> to vector<256x128xbf16>
    %c240_i32 = arith.constant 240 : i32
    %62 = tpu.dynamic_rotate %9 by %c240_i32 dim 0 : vector<256x128xf32>, i32 -> vector<256x128xf32>
    %cst_17 = arith.constant 0.000000e+00 : f32
    %63 = vector.shape_cast %17 : vector<256x1xi1> to vector<256x1xi1>
    %64 = vector.broadcast %63 : vector<256x1xi1> to vector<256x128xi1>
    %65 = vector.broadcast %cst_17 : f32 to vector<256x128xf32>
    %66 = arith.select %64, %62, %65 : vector<256x128xi1>, vector<256x128xf32>
    %67 = arith.truncf %66 : vector<256x128xf32> to vector<256x128xbf16>
    %c239_i32 = arith.constant 239 : i32
    %68 = tpu.dynamic_rotate %9 by %c239_i32 dim 0 : vector<256x128xf32>, i32 -> vector<256x128xf32>
    %69 = arith.andi %17, %21 : vector<256x1xi1>
    %cst_18 = arith.constant 0.000000e+00 : f32
    %70 = vector.shape_cast %69 : vector<256x1xi1> to vector<256x1xi1>
    %71 = vector.broadcast %70 : vector<256x1xi1> to vector<256x128xi1>
    %72 = vector.broadcast %cst_18 : f32 to vector<256x128xf32>
    %73 = arith.select %71, %68, %72 : vector<256x128xi1>, vector<256x128xf32>
    %74 = arith.truncf %73 : vector<256x128xf32> to vector<256x128xbf16>
    %75 = tpu.concatenate %28, %34, %41, %47, %48, %54, %61, %67, %74 in 1 : vector<256x128xbf16>, vector<256x128xbf16>, vector<256x128xbf16>, vector<256x128xbf16>, vector<256x128xbf16>, vector<256x128xbf16>, vector<256x128xbf16>, vector<256x128xbf16>, vector<256x128xbf16> -> vector<256x1152xbf16>
    %c0_19 = arith.constant 0 : index
    %c0_20 = arith.constant 0 : index
    %76 = vector.load %arg4[%c0_19, %c0_20] : memref<1152x128xbf16, #tpu.memory_space<vmem>>, vector<1152x128xbf16>
    %cst_21 = arith.constant dense<0.000000e+00> : vector<256x128xf32>
    %77 = tpu.matmul %75, %76, %cst_21 {dimension_numbers = #tpu.dot_dimension_numbers<[1], [0], [0], [1], [0, 0, 1, 1], [], []>} : vector<256x1152xbf16>, vector<1152x128xbf16>, vector<256x128xf32> -> vector<256x128xf32>
    %c0_22 = arith.constant 0 : index
    %c0_23 = arith.constant 0 : index
    %78 = vector.load %arg5[%c0_22, %c0_23] : memref<1x128xf32, #tpu.memory_space<vmem>>, vector<1x128xf32>
    %79 = vector.broadcast %78 : vector<1x128xf32> to vector<256x128xf32>
    %80 = arith.addf %77, %79 : vector<256x128xf32>
    %cst_24 = arith.constant 0.000000e+00 : f32
    %81 = vector.broadcast %cst_24 : f32 to vector<256x128xf32>
    %82 = arith.maximumf %80, %81 : vector<256x128xf32>
    %83 = arith.truncf %82 : vector<256x128xf32> to vector<256x128xbf16>
    %c0_25 = arith.constant 0 : index
    %c0_26 = arith.constant 0 : index
    %84 = vector.load %arg6[%c0_25, %c0_26] : memref<128x128xbf16, #tpu.memory_space<vmem>>, vector<128x128xbf16>
    %cst_27 = arith.constant dense<0.000000e+00> : vector<256x128xf32>
    %85 = tpu.matmul %83, %84, %cst_27 {dimension_numbers = #tpu.dot_dimension_numbers<[1], [0], [0], [1], [0, 0, 1, 1], [], []>} : vector<256x128xbf16>, vector<128x128xbf16>, vector<256x128xf32> -> vector<256x128xf32>
    %c0_28 = arith.constant 0 : index
    %c0_29 = arith.constant 0 : index
    %86 = vector.load %arg7[%c0_28, %c0_29] : memref<1x128xf32, #tpu.memory_space<vmem>>, vector<1x128xf32>
    %87 = vector.broadcast %86 : vector<1x128xf32> to vector<256x128xf32>
    %88 = arith.addf %85, %87 : vector<256x128xf32>
    %c0_30 = arith.constant 0 : index
    %c0_31 = arith.constant 0 : index
    %c0_32 = arith.constant 0 : index
    %c0_33 = arith.constant 0 : index
    %89 = vector.load %arg1[%c0_30, %c0_31, %c0_32, %c0_33] : memref<1x16x16x128xf32, #tpu.memory_space<vmem>>, vector<1x16x16x128xf32>
    %90 = vector.shape_cast %89 : vector<1x16x16x128xf32> to vector<256x128xf32>
    %91 = arith.addf %88, %90 : vector<256x128xf32>
    %cst_34 = arith.constant 0.000000e+00 : f32
    %92 = vector.broadcast %cst_34 : f32 to vector<256x128xf32>
    %93 = arith.maximumf %91, %92 : vector<256x128xf32>
    %94 = vector.shape_cast %93 : vector<256x128xf32> to vector<1x16x16x128xf32>
    %c0_35 = arith.constant 0 : index
    %c0_36 = arith.constant 0 : index
    %c0_37 = arith.constant 0 : index
    %c0_38 = arith.constant 0 : index
    %95 = vector.load %arg8[%c0_35, %c0_36, %c0_37, %c0_38] : memref<1x16x16x128xf32, #tpu.memory_space<vmem>>, vector<1x16x16x128xf32>
    tpu.vector_store %arg8[%c0_35, %c0_36, %c0_37, %c0_38], %94 {strides = array<i32>} : memref<1x16x16x128xf32, #tpu.memory_space<vmem>>, vector<1x16x16x128xf32>,
    return
  }
  func.func @transform_0(%arg0: i32) -> (i32, i32, i32, i32) {
    %c0_i32 = arith.constant 0 : i32
    %c0_i32_0 = arith.constant 0 : i32
    %c0_i32_1 = arith.constant 0 : i32
    %c0_i32_2 = arith.constant 0 : i32
    return %arg0, %c0_i32, %c0_i32_0, %c0_i32_1 : i32, i32, i32, i32
  }
  func.func @transform_1(%arg0: i32) -> (i32, i32) {
    %c0_i32 = arith.constant 0 : i32
    %c0_i32_0 = arith.constant 0 : i32
    %c0_i32_1 = arith.constant 0 : i32
    return %c0_i32, %c0_i32_0 : i32, i32
  }
  func.func @transform_2(%arg0: i32) -> (i32, i32) {
    %c0_i32 = arith.constant 0 : i32
    %c0_i32_0 = arith.constant 0 : i32
    %c0_i32_1 = arith.constant 0 : i32
    return %c0_i32, %c0_i32_0 : i32, i32
  }
  func.func @transform_3(%arg0: i32) -> (i32, i32) {
    %c0_i32 = arith.constant 0 : i32
    %c0_i32_0 = arith.constant 0 : i32
    %c0_i32_1 = arith.constant 0 : i32
    return %c0_i32, %c0_i32_0 : i32, i32
  }
  func.func @transform_4(%arg0: i32) -> (i32, i32) {
    %c0_i32 = arith.constant 0 : i32
    %c0_i32_0 = arith.constant 0 : i32
    %c0_i32_1 = arith.constant 0 : i32
    return %c0_i32, %c0_i32_0 : i32, i32
  }
  func.func @transform_5(%arg0: i32) -> (i32, i32) {
    %c0_i32 = arith.constant 0 : i32
    %c0_i32_0 = arith.constant 0 : i32
    %c0_i32_1 = arith.constant 0 : i32
    return %c0_i32, %c0_i32_0 : i32, i32
  }
  func.func @transform_6(%arg0: i32) -> (i32, i32) {
    %c0_i32 = arith.constant 0 : i32
    %c0_i32_0 = arith.constant 0 : i32
    %c0_i32_1 = arith.constant 0 : i32
    return %c0_i32, %c0_i32_0 : i32, i32
  }
  func.func @transform_7(%arg0: i32) -> (i32, i32, i32, i32) {
    %c0_i32 = arith.constant 0 : i32
    %c0_i32_0 = arith.constant 0 : i32
    %c0_i32_1 = arith.constant 0 : i32
    %c0_i32_2 = arith.constant 0 : i32
    return %arg0, %c0_i32, %c0_i32_0, %c0_i32_1 : i32, i32, i32, i32
  }
}

</mosaic_0001>

<bundles_post_ra>
// kernel: tpu_custom_call.1
= control target key start
LH: loop header
LB: loop body
LE: loop exit
PB: predicated region body
PF: predicated region fallthrough
CT: control target
= control target key end

     0   :  { %12 = vsyncpa [#allocation3], 0  ;;  %s5965_s0 = inlined_call_operand.hbm [shape: f32[2,16,16,128], index: 0, kind: input, shape index: {}]   ;;  %s5966_s1 = inlined_call_operand.hbm [shape: bf16[128,128], index: 1, kind: input, shape index: {}]   ;;  %s5967_s2 = inlined_call_operand.vmem [shape: f32[1,128], index: 2, kind: input, shape index: {}]   ;;  %s5968_s3 = inlined_call_operand.hbm [shape: bf16[1152,128], index: 3, kind: input, shape index: {}]   ;;  %s5969_s4 = inlined_call_operand.vmem [shape: f32[1,128], index: 4, kind: input, shape index: {}]   ;;  %s5970_s5 = inlined_call_operand.hbm [shape: bf16[128,128], index: 5, kind: input, shape index: {}]   ;;  %s5971_s6 = inlined_call_operand.vmem [shape: f32[1,128], index: 6, kind: input, shape index: {}]   ;;  %s5972_s7 = inlined_call_operand.hbm [shape: f32[2,16,16,128], index: 7, kind: output, shape index: {}]  }
   0x1   :  { %14 = vsyncpa [#allocation3 + $0x1], 0 }
   0x2   :  { %15 = vsyncpa [#allocation6], 0 }
   0x3   :  { %16 = vsyncpa [#allocation9], 0 }
   0x4   :  { %17 = vsyncpa [#allocation4], 0 }
   0x5   :  { %19 = vsyncpa [#allocation4 + $0x1], 0  ;;  %s4309_s24 = smov 0   ;;  %s4311_s25 = smov 0  }
   0x6   :  { %s4313_s26 = smov 0   ;;  %s4315_s27 = smov 0  }
   0x7 LB: > { %s4330_s28 = sadd.s32 4294967295, %s4254_s27   ;;  %s2792_s29 = sadd.s32 4294967294, %s4254_s27   ;;  %s4254_s27 = sphi %s4315_s27, %s6114_s27   ;;  %s4250_s26 = sphi %s4313_s26, %s6113_s26   ;;  %s4246_s25 = sphi %s4311_s25, %s6112_s25   ;;  %s4242_s24 = sphi %s4309_s24, %s6111_s24  }
   0x8   : > { %p45_p0 = scmp.ne.s32.totalorder %s4246_s25, %s4242_s24  ;;  %p5973_p1 = scmp.eq.s32.totalorder %s4330_s28, 0 }
   0x9   : > { %p201_p3 = scmp.eq.s32.totalorder %s2792_s29, 1  ;;  %p2793_p5 = scmp.ge.s32.totalorder %s4254_s27, 1 }
   0xa   : > { %p4339_p4 = por %p5973_p1, %p45_p0  ;;  %p208_p7 = scmp.lt.s32.totalorder %s4254_s27, 3 }
   0xb   : > { %p4344_p6 = por %p201_p3, %p45_p0  ;;  %s4256_s10 = smov [#allocation5]  }
   0xc   : > { %s5989_s30 = scalar_select %p4339_p4, 1, 0 }
   0xd   : > { %s5990_s8 = scalar_select %p4344_p6, 1, 0 }
   0xe   : > { %p4349_p8 = pnand %p2793_p5, %p208_p7  ;;  %s220_s11 = sshll.u32 %s4256_s10, 4  ;;  %s4353_s11 = int_to_ptr.vmem [resolvable:$true] %s220_s11 }
   0xf   : > { %5991 = sst [smem:[#allocation15_spill]] %s5990_s8  ;;  %s4257_s13 = smov [#allocation7]  }
  0x10   : > { %s5992_s9 = scalar_select %p4349_p8, 1, 0 }
  0x11   : > { %p3877_p9 = pneg %p4349_p8  ;;  %s236_s14 = sshll.u32 %s4257_s13, 4  ;;  %s4364_s14 = int_to_ptr.vmem [resolvable:$true] %s236_s14 }
  0x12   : > { %s4258_s15 = smov [#allocation8]   ;;  %s4066_s19 = scalar_lea.hbm %s5966_s1, 1024 }
  0x13   : > { %p4360_p11 = pnand %p3877_p9, %p5973_p1  ;;  %s4366_s16 = sshll.u32 %s4258_s15, 4  ;;  %s253_s16 = int_to_ptr.vmem [resolvable:$true] %s4366_s16 }
  0x14   : > { %p4067_p12 = scmp.ne.s32.totalorder %s5966_s1, %s4066_s19  ;;  %p4073_p5 = scmp.lt.u32.totalorder %s4066_s19, %s5966_s1 }
  0x15   : > { %p4376_p13 = pneg %p4360_p11 }
  0x17   : > { %p4069_p0 = pnand %p4376_p13, %p4067_p12 }
  0x19   : > { %p4070_p3 = pneg %p4069_p0 }
  0x1b   : > { %p4075_p7 = pnand %p4073_p5, %p4070_p3 }
  0x1d   : > { %4078 = shalt.err (!%p4075_p7)
}
  0x1e   : > { %s4079_s10 = scalar_lea.vmem %s4353_s11, 1024  ;;  %p4087_p2 = scmp.lt.s32.totalorder %s4353_s11, %s4353_s11 }
  0x1f   : > { %p4080_p9 = scmp.ne.s32.totalorder %s4353_s11, %s4079_s10  ;;  %p4088_p6 = scmp.lt.s32.totalorder %s4079_s10, %s4079_s10 }
  0x21   : > { %p4082_p10 = pnand %p4080_p9, %p4376_p13  ;;  %p4089_p12 = por %p4088_p6, %p4087_p2 }
  0x23   : > { %p4083_p1 = pneg %p4082_p10 }
  0x25   : > { %p4090_p0 = pnand %p4089_p12, %p4083_p1 }
  0x27   : > { %4093 = shalt.err (!%p4090_p0)
}
  0x28   : > { %s4259_s13 = smov 64   ;;  %s4260_s15 = smov 4  }
  0x29   : > { %3880 = dma.hbm_to_vmem [thread:$0]  (!%p4360_p11), %s5966_s1, 1024, %s4353_s11, [#allocation6], %s4259_s13, %s4259_s13, %s4260_s15  }
  0x2a   : > { %s4094_s21 = scalar_lea.hbm %s5968_s3, 9216 }
  0x2b   : > { %p4095_p1 = scmp.ne.s32.totalorder %s5968_s3, %s4094_s21  ;;  %p4101_p10 = scmp.lt.u32.totalorder %s4094_s21, %s5968_s3 }
  0x2d   : > { %p4097_p2 = pnand %p4095_p1, %p4376_p13 }
  0x2f   : > { %p4098_p6 = pneg %p4097_p2 }
  0x31   : > { %p4103_p3 = pnand %p4101_p10, %p4098_p6 }
  0x33   : > { %4106 = shalt.err (!%p4103_p3)
}
  0x34   : > { %s4107_s11 = scalar_lea.vmem %s4364_s14, 9216  ;;  %p4115_p12 = scmp.lt.s32.totalorder %s4364_s14, %s4364_s14 }
  0x35   : > { %p4108_p5 = scmp.ne.s32.totalorder %s4364_s14, %s4107_s11  ;;  %p4116_p0 = scmp.lt.s32.totalorder %s4107_s11, %s4107_s11 }
  0x37   : > { %p4110_p7 = pnand %p4108_p5, %p4376_p13  ;;  %p4117_p1 = por %p4116_p0, %p4115_p12 }
  0x39   : > { %p4111_p9 = pneg %p4110_p7 }
  0x3b   : > { %p4118_p2 = pnand %p4117_p1, %p4111_p9 }
  0x3d   : > { %4121 = shalt.err (!%p4118_p2)
}
  0x3e   : > { %3883 = dma.hbm_to_vmem [thread:$0]  (!%p4360_p11), %s5968_s3, 9216, %s4364_s14, [#allocation6], %s4259_s13, %s4259_s13, %s4260_s15  }
  0x3f   : > { %s4122_s20 = scalar_lea.hbm %s5970_s5, 1024 }
  0x40   : > { %p4123_p6 = scmp.ne.s32.totalorder %s5970_s5, %s4122_s20  ;;  %p4129_p5 = scmp.lt.u32.totalorder %s4122_s20, %s5970_s5 }
  0x42   : > { %p4125_p10 = pnand %p4123_p6, %p4376_p13 }
  0x44   : > { %p4126_p3 = pneg %p4125_p10 }
  0x46   : > { %p4131_p7 = pnand %p4129_p5, %p4126_p3 }
  0x48   : > { %4134 = shalt.err (!%p4131_p7)
}
  0x49   : > { %s4135_s11 = scalar_lea.vmem %s253_s16, 1024  ;;  %p4143_p1 = scmp.lt.s32.totalorder %s253_s16, %s253_s16 }
  0x4a   : > { %p4136_p9 = scmp.ne.s32.totalorder %s253_s16, %s4135_s11  ;;  %p4144_p2 = scmp.lt.s32.totalorder %s4135_s11, %s4135_s11 }
  0x4c   : > { %p4138_p12 = pnand %p4136_p9, %p4376_p13  ;;  %p4145_p4 = por %p4144_p2, %p4143_p1 }
  0x4e   : > { %p4139_p0 = pneg %p4138_p12 }
  0x50   : > { %p4146_p8 = pnand %p4145_p4, %p4139_p0 }
  0x52   : > { %4149 = shalt.err (!%p4146_p8)
}
  0x53   : > { %3886 = dma.hbm_to_vmem [thread:$0]  (!%p4360_p11), %s5970_s5, 1024, %s253_s16, [#allocation9], %s4259_s13, %s4259_s13, %s4260_s15  }
  0x54   : > { %s4449_s22 = sadd.s32 1, %s4254_s27   ;;  %s32_s17 = sadd.s32 1, %s4250_s26 }
  0x55   : > { %s29_s12 = ssub.s32 %s4254_s27, %s4449_s22  ;;  %p39_p8 = scmp.ne.s32.totalorder %s4250_s26, %s4246_s25 }
  0x56   : > { %p30_p4 = scmp.eq.s32.totalorder %s29_s12, 0  ;;  %p40_p13 = scmp.eq.s32.totalorder %s4254_s27, 0 }
  0x57   : > { %p3898_p6 = scmp.lt.s32.totalorder %s4254_s27, 2  ;;  %p5995_p3 = scmp.eq.s32.totalorder %s4330_s28, 1 }
  0x58   : > { %s4459_s18 = scalar_select %p30_p4, %s4250_s26, %s32_s17  }
  0x59   : > { %p41_p10 = por %p40_p13, %p39_p8  ;;  %p4463_p5 = por %p5995_p3, %p39_p8 }
  0x5a   : > { %s269_s20 = sand.u32 1, %s4250_s26   ;;  %s3179_s21 = sshll.u32 %s4254_s27, 12 }
  0x5b   : > { %s2798_s16 = sshll.u32 %s269_s20, 8  ;;  %s4472_s23 = scalar_lea.hbm %s5965_s0, %s3179_s21 }
  0x5c   : > { %s273_s29 = scalar_lea.vmem [#allocation2], %s2798_s16  ;;  %p4474_p11 = pnand %p3898_p6, %p41_p10 }
  0x5d   : > { %s280_s10 = sshll.u32 %s273_s29, 4  ;;  %s4480_s14 = scalar_lea.sflag [#allocation3], %s269_s20  ;;  %s4478_s10 = int_to_ptr.vmem [resolvable:$true] %s280_s10 }
  0x5e   : > { %s4150_s8 = scalar_lea.hbm %s4472_s23, 4096  ;;  %p4152_p9 = pneg %p4474_p11 }
  0x5f   : > { %p4151_p7 = scmp.ne.s32.totalorder %s4472_s23, %s4150_s8  ;;  %s4155_s21 = scalar_lea.hbm %s5965_s0, 8192 }
  0x60   : > { %p4156_p1 = scmp.lt.u32.totalorder %s4472_s23, %s5965_s0  ;;  %p4157_p2 = scmp.lt.u32.totalorder %s4155_s21, %s4150_s8 }
  0x61   : > { %p4153_p12 = pnand %p4152_p9, %p4151_p7  ;;  %p4159_p8 = scmp.lt.u32.totalorder %s4150_s8, %s4472_s23 }
  0x62   : > { %p4158_p4 = por %p4157_p2, %p4156_p1 }
  0x63   : > { %p4154_p0 = pneg %p4153_p12 }
  0x64   : > { %p4160_p13 = por %p4159_p8, %p4158_p4 }
  0x66   : > { %p4161_p6 = pnand %p4160_p13, %p4154_p0 }
  0x68   : > { %4164 = shalt.err (!%p4161_p6)
}
  0x69   : > { %s4165_s20 = scalar_lea.vmem %s4478_s10, 4096  ;;  %s4261_s15 = smov [#allocation2]  }
  0x6a   : > { %p4166_p10 = scmp.ne.s32.totalorder %s4478_s10, %s4165_s20  ;;  %s4170_s29 = sshll.u32 %s4261_s15, 4  ;;  %s4171_s29 = int_to_ptr.vmem [resolvable:$false] %s4170_s29 }
  0x6b   : > { %s4172_s12 = scalar_lea.vmem %s4171_s29, 8192  ;;  %p4173_p12 = scmp.lt.s32.totalorder %s4478_s10, %s4171_s29 }
  0x6c   : > { %p4168_p3 = pnand %p4166_p10, %p4152_p9  ;;  %p4174_p1 = scmp.lt.s32.totalorder %s4172_s12, %s4165_s20 }
  0x6e   : > { %p4169_p7 = pneg %p4168_p3  ;;  %p4175_p2 = por %p4174_p1, %p4173_p12 }
  0x70   : > { %p4176_p4 = pnand %p4175_p2, %p4169_p7 }
  0x72   : > { %4179 = shalt.err (!%p4176_p4)
}
  0x73   : > { %s4262_s8 = smov 128   ;;  %s4263_s17 = smov 8  }
  0x74   : > { %3890 = dma.hbm_to_vmem [thread:$0]  (!%p4474_p11), %s4472_s23, 4096, %s4478_s10, %s4480_s14, %s4262_s8, %s4262_s8, %s4263_s17  }
  0x75   : > { %p5998_p9 = scmp.ne.s32.totalorder %s5992_s9, 0 }
  0x77   : > { %292 = sbr.rel (%p5998_p9) target bundleno = 1180 (0x49c), region = 48 }
  0x7e   : > { %s4511_s21 = sand.u32 1, %s4246_s25   ;;  %p5999_p0 = scmp.ne.s32.totalorder %s5989_s30, 0 }
  0x7f   : > { %s2802_s16 = sshll.u32 %s4511_s21, 8  ;;  %s295_s13 = scalar_lea.sflag [#allocation3], %s4511_s21 }
  0x80   : > { %s4517_s20 = scalar_lea.vmem [#allocation2], %s2802_s16 }
  0x81   : > { %4225 = dma.done.wait (%p5999_p0), %s295_s13, 4096  }
  0x82   : > { %4227 = vsyncadd (%p5999_p0), %s295_s13, 4294963200  ;;  %p6000_p11 = scmp.eq.s32.totalorder %s4330_s28, 0 }
  0x84   : > { %4229 = dma.done.wait (%p6000_p11), [#allocation6], 10240   ;;  %p6001_p8 = pmov %p6000_p11 }
  0x86   : > { %4231 = vsyncadd (%p6001_p8), [#allocation6], 4294957056  ;;  %p6002_p13 = pmov %p6001_p8 }
  0x87   : > { %p6003_p6 = pmov %p6001_p8 }
  0x88   : > { %4233 = dma.done.wait (%p6002_p13), [#allocation9], 1024  }
  0x89   : > { %4235 = vsyncadd (%p6003_p6), [#allocation9], 4294966272  ;;  %v3946_v0 = vld [vmem:[#allocation5] sm:$0xff]   ;;  %v3947_v1 = vld [vmem:[#allocation5 + $0x8] sm:$0xff]   ;;  %vm4265_vm4 = vmmov 1   ;;  %s5824_s15 = scalar_lea.vmem [#allocation10], %s2802_s16 }
  0x8a   : > { %3701 = vmatprep.subr.bf16.mxu0 %v3946_v0  ;;  %3845 = vmatprep.subr.bf16.mxu1 %v3946_v0  ;;  %v3948_v2 = vld [vmem:[#allocation5 + $0x10] sm:$0xff]   ;;  %v3949_v3 = vld [vmem:[#allocation5 + $0x18] sm:$0xff]   ;;  %v342_v4 = vld [vmem:[%s4517_s20] sm:$0xff]  ;;  %s3180_s29 = sshll.u32 %s4330_s28, 12  ;;  %s2690_s12 = sshll.u32 %s5824_s15, 4  ;;  %s5918_s12 = int_to_ptr.vmem [resolvable:$true] %s2690_s12 }
  0x8b   : > { %3702 = vmatpush3.bf16.msra.mxu0 %v3946_v0  ;;  %3853 = vmatpush3.bf16.msra.mxu1 %v3946_v0  ;;  %v343_v5 = vld [vmem:[%s4517_s20 + $0x8] sm:$0xff]  ;;  %v358_v6 = vld [vmem:[%s4517_s20 + $0x80] sm:$0xff]  ;;  %v3952_v12 = vld [vmem:[#allocation5 + $0x30] sm:$0xff]   ;;  %s5916_s16 = scalar_lea.hbm %s5972_s7, %s3180_s29  ;;  %s2677_s28 = scalar_lea.sflag [#allocation4], %s4511_s21 }
  0x8c   : > { %3703 = vmatprep.subr.bf16.mxu0 %v3947_v1  ;;  %3846 = vmatprep.subr.bf16.mxu1 %v3947_v1  ;;  %v374_v7 = vpack.c.bf16 %v343_v5, %v342_v4  ;;  %v359_v8 = vld [vmem:[%s4517_s20 + $0x88] sm:$0xff]  ;;  %v3950_v10 = vld [vmem:[#allocation5 + $0x20] sm:$0xff]   ;;  %v3953_v13 = vld [vmem:[#allocation5 + $0x38] sm:$0xff]   ;;  %s4180_s13 = scalar_lea.vmem %s5918_s12, 4096 }
  0x8d   : > { %v382_v9 = vpack.c.bf16 %v359_v8, %v358_v6  ;;  %v3951_v11 = vld [vmem:[#allocation5 + $0x28] sm:$0xff]   ;;  %v344_v14 = vld [vmem:[%s4517_s20 + $0x10] sm:$0xff]  ;;  %v345_v15 = vld [vmem:[%s4517_s20 + $0x18] sm:$0xff]  ;;  %p4181_p10 = scmp.ne.s32.totalorder %s5918_s12, %s4180_s13 }
  0x8e   : > { %3717 = vmatprep.mubr.bf16.mxu0 %v374_v7  ;;  %v360_v16 = vld [vmem:[%s4517_s20 + $0x90] sm:$0xff]  ;;  %v361_v17 = vld [vmem:[%s4517_s20 + $0x98] sm:$0xff]  ;;  %v346_v18 = vld [vmem:[%s4517_s20 + $0x20] sm:$0xff]  ;;  %v375_v23 = vpack.c.bf16 %v345_v15, %v344_v14 }
  0x8f   : > { %3704 = vmatpush3.bf16.msra.mxu0 %v3947_v1  ;;  %3854 = vmatpush3.bf16.msra.mxu1 %v3947_v1  ;;  %v347_v19 = vld [vmem:[%s4517_s20 + $0x28] sm:$0xff]  ;;  %v362_v20 = vld [vmem:[%s4517_s20 + $0xa0] sm:$0xff]  ;;  %v383_v24 = vpack.c.bf16 %v361_v17, %v360_v16  ;;  %v348_v29 = vld [vmem:[%s4517_s20 + $0x30] sm:$0xff]  ;;  %p4182_p3 = pnand %p4181_p10, %p4463_p5 }
  0x90   : > { %3705 = vmatprep.subr.bf16.mxu0 %v3948_v2  ;;  %3847 = vmatprep.subr.bf16.mxu1 %v3948_v2  ;;  %v363_v21 = vld [vmem:[%s4517_s20 + $0xa8] sm:$0xff]  ;;  %v3954_v22 = vld [vmem:[#allocation7 + $0x40] sm:$0xff]   ;;  %v376_v26 = vpack.c.bf16 %v347_v19, %v346_v18  ;;  %v349_v30 = vld [vmem:[%s4517_s20 + $0x38] sm:$0xff]  ;;  %v5977_v19 = vmov 0.0|0.0  }
  0x91   : > { %3733 = vmatprep.mubr.bf16.mxu1 %v382_v9  ;;  %v3955_v25 = vld [vmem:[#allocation7] sm:$0xff]   ;;  %v384_v27 = vpack.c.bf16 %v363_v21, %v362_v20  ;;  %v3956_v28 = vld [vmem:[#allocation7 + $0x48] sm:$0xff]   ;;  %v364_v31 = vld [vmem:[%s4517_s20 + $0xb0] sm:$0xff]  ;;  %v377_v38 = vpack.c.bf16 %v349_v30, %v348_v29  ;;  %p4183_p7 = pneg %p4182_p3 }
  0x92   : > { %v365_v32 = vld [vmem:[%s4517_s20 + $0xb8] sm:$0xff]  ;;  %v350_v33 = vld [vmem:[%s4517_s20 + $0x40] sm:$0xff]  ;;  %v351_v34 = vld [vmem:[%s4517_s20 + $0x48] sm:$0xff] }
  0x93   : > { %3706 = vmatpush3.bf16.msra.mxu0 %v3948_v2  ;;  %3855 = vmatpush3.bf16.msra.mxu1 %v3948_v2  ;;  %v366_v35 = vld [vmem:[%s4517_s20 + $0xc0] sm:$0xff]  ;;  %v367_v36 = vld [vmem:[%s4517_s20 + $0xc8] sm:$0xff]  ;;  %v385_v39 = vpack.c.bf16 %v365_v32, %v364_v31  ;;  %v378_v40 = vpack.c.bf16 %v351_v34, %v350_v33  ;;  %v352_v42 = vld [vmem:[%s4517_s20 + $0x50] sm:$0xff] }
  0x94   : > { %3707 = vmatprep.subr.bf16.mxu0 %v3949_v3  ;;  %3848 = vmatprep.subr.bf16.mxu1 %v3949_v3  ;;  %v3957_v37 = vld [vmem:[#allocation7 + $0x8] sm:$0xff]   ;;  %v386_v41 = vpack.c.bf16 %v367_v36, %v366_v35  ;;  %v353_v43 = vld [vmem:[%s4517_s20 + $0x58] sm:$0xff]  ;;  %v368_v44 = vld [vmem:[%s4517_s20 + $0xd0] sm:$0xff] }
  0x95   : > { %v369_v45 = vld [vmem:[%s4517_s20 + $0xd8] sm:$0xff]  ;;  %v354_v46 = vld [vmem:[%s4517_s20 + $0x60] sm:$0xff]  ;;  %v355_v47 = vld [vmem:[%s4517_s20 + $0x68] sm:$0xff]  ;;  %v379_v50 = vpack.c.bf16 %v353_v43, %v352_v42 }
  0x96   : > { %v370_v48 = vld [vmem:[%s4517_s20 + $0xe0] sm:$0xff]  ;;  %v371_v49 = vld [vmem:[%s4517_s20 + $0xe8] sm:$0xff]  ;;  %v387_v51 = vpack.c.bf16 %v369_v45, %v368_v44  ;;  %v380_v52 = vpack.c.bf16 %v355_v47, %v354_v46  ;;  %v356_v54 = vld [vmem:[%s4517_s20 + $0x70] sm:$0xff] }
  0x97   : > { %3708 = vmatpush3.bf16.msra.mxu0 %v3949_v3  ;;  %3856 = vmatpush3.bf16.msra.mxu1 %v3949_v3  ;;  %v388_v53 = vpack.c.bf16 %v371_v49, %v370_v48  ;;  %v357_v55 = vld [vmem:[%s4517_s20 + $0x78] sm:$0xff]  ;;  %v372_v56 = vld [vmem:[%s4517_s20 + $0xf0] sm:$0xff]  ;;  %v3961_v63 = vld [vmem:[#allocation7 + $0xc0] sm:$0xff]  }
  0x98   : > { %3709 = vmatprep.subr.bf16.mxu0 %v3950_v10  ;;  %3849 = vmatprep.subr.bf16.mxu1 %v3950_v10  ;;  %v373_v57 = vld [vmem:[%s4517_s20 + $0xf8] sm:$0xff]  ;;  %v381_v58 = vpack.c.bf16 %v357_v55, %v356_v54  ;;  %v3958_v60 = vld [vmem:[#allocation7 + $0x50] sm:$0xff]   ;;  %v3963_v1 = vld [vmem:[#allocation7 + $0x80] sm:$0xff]  }
  0x99   : > { %v389_v59 = vpack.c.bf16 %v373_v57, %v372_v56  ;;  %v3959_v61 = vld [vmem:[#allocation7 + $0x10] sm:$0xff]   ;;  %v3960_v62 = vld [vmem:[#allocation7 + $0x58] sm:$0xff]   ;;  %v3964_v2 = vld [vmem:[#allocation7 + $0x60] sm:$0xff]  }
  0x9a   : > { %v3962_v0 = vld [vmem:[#allocation7 + $0x18] sm:$0xff]   ;;  %v3965_v3 = vld [vmem:[#allocation7 + $0xc8] sm:$0xff]   ;;  %v3966_v4 = vld [vmem:[#allocation7 + $0x20] sm:$0xff]  }
  0x9b   : > { %3710 = vmatpush3.bf16.msra.mxu0 %v3950_v10  ;;  %3857 = vmatpush3.bf16.msra.mxu1 %v3950_v10  ;;  %v3967_v5 = vld [vmem:[#allocation7 + $0x88] sm:$0xff]   ;;  %v3969_v7 = vld [vmem:[#allocation7 + $0xd0] sm:$0xff]   ;;  %v3976_v14 = vld [vmem:[#allocation7 + $0x78] sm:$0xff]  }
  0x9c   : > { %3711 = vmatprep.subr.bf16.mxu0 %v3951_v11  ;;  %3850 = vmatprep.subr.bf16.mxu1 %v3951_v11  ;;  %v3968_v6 = vld [vmem:[#allocation7 + $0x68] sm:$0xff]   ;;  %v3971_v9 = vld [vmem:[#allocation7 + $0x90] sm:$0xff]   ;;  %v3977_v15 = vld [vmem:[#allocation7 + $0xe0] sm:$0xff]  }
  0x9d   : > { %v3970_v8 = vld [vmem:[#allocation7 + $0x28] sm:$0xff]   ;;  %v3972_v10 = vld [vmem:[#allocation7 + $0x70] sm:$0xff]   ;;  %v3978_v16 = vld [vmem:[#allocation7 + $0x38] sm:$0xff]  }
  0x9e   : > { %v3979_v17 = vld [vmem:[#allocation7 + $0xa0] sm:$0xff]   ;;  %v3980_v18 = vld [vmem:[#allocation7 + $0xe8] sm:$0xff]   ;;  %v3984_v21 = vld [vmem:[#allocation7 + $0xf0] sm:$0xff]  }
  0x9f   : > { %3712 = vmatpush3.bf16.msra.mxu0 %v3951_v11  ;;  %3858 = vmatpush3.bf16.msra.mxu1 %v3951_v11  ;;  %v3973_v11 = vld [vmem:[#allocation7 + $0xd8] sm:$0xff]   ;;  %v3981_v20 = vld [vmem:[#allocation7 + $0xa8] sm:$0xff]   ;;  %v3990_v29 = vld [vmem:[#allocation7 + $0x150] sm:$0xff]  }
  0xa0   : > { %3713 = vmatprep.subr.bf16.mxu0 %v3952_v12  ;;  %3851 = vmatprep.subr.bf16.mxu1 %v3952_v12  ;;  %v3991_v30 = vld [vmem:[#allocation7 + $0x110] sm:$0xff]   ;;  %v3992_v31 = vld [vmem:[#allocation7 + $0x158] sm:$0xff]   ;;  %v3994_v33 = vld [vmem:[#allocation7 + $0x1c0] sm:$0xff]  }
  0xa1   : > { %v3993_v32 = vld [vmem:[#allocation7 + $0x118] sm:$0xff]   ;;  %v3996_v34 = vld [vmem:[#allocation7 + $0x160] sm:$0xff]   ;;  %v4000_v36 = vld [vmem:[#allocation7 + $0x168] sm:$0xff]  }
  0xa2   : > { %v3997_v35 = vld [vmem:[#allocation7 + $0x120] sm:$0xff]   ;;  %v4005_v43 = vld [vmem:[#allocation7 + $0x130] sm:$0xff]  }
  0xa3   : > { %3714 = vmatpush3.bf16.msra.mxu0 %v3952_v12  ;;  %3859 = vmatpush3.bf16.msra.mxu1 %v3952_v12  ;;  %v3974_v12 = vld [vmem:[#allocation7 + $0x30] sm:$0xff]  }
  0xa4   : > { %3715 = vmatprep.subr.bf16.mxu0 %v3953_v13  ;;  %3852 = vmatprep.subr.bf16.mxu1 %v3953_v13 }
  0xa7   : > { %3716 = vmatpush3.bf16.msra.mxu0 %v3953_v13  ;;  %3860 = vmatpush3.bf16.msra.mxu1 %v3953_v13  ;;  %v3975_v13 = vld [vmem:[#allocation7 + $0x98] sm:$0xff]  }
  0xa8   : > { %3205 = vmatprep.subr.bf16.mxu1 %v3954_v22  ;;  %3317 = vmatprep.subr.bf16.mxu0 %v3961_v63  ;;  %v3985_v22 = vld [vmem:[#allocation7 + $0xb0] sm:$0xff]  }
  0xaa   : > { %3718 = vmatmul.mubr.bf16.vlgmr.msra.gmra.mrb[0].mxu0 %v375_v23  ;;  %3734 = vmatmul.mubr.bf16.vlgmr.msra.gmra.mrb[0].mxu1 %v383_v24  ;;  %v3986_v23 = vld [vmem:[#allocation7 + $0xf8] sm:$0xff]   ;;  %v3982_v24 = vld [vmem:[#allocation7 + $0x140] sm:$0xff]  }
  0xab   : > { %3721 = vmatprep.mubr.bf16.mxu0 %v376_v26  ;;  %3737 = vmatprep.mubr.bf16.mxu1 %v384_v27  ;;  %v3987_v26 = vld [vmem:[#allocation7 + $0xb8] sm:$0xff]   ;;  %v3988_v27 = vld [vmem:[#allocation7 + $0x148] sm:$0xff]  }
  0xac   : > { %3206 = vmatpush3.bf16.msra.mxu1 %v3955_v25  ;;  %3318 = vmatpush3.bf16.msra.mxu0 %v3963_v1  ;;  %v3983_v25 = vld [vmem:[#allocation7 + $0x100] sm:$0xff]  }
  0xad   : > { %3207 = vmatprep.subr.bf16.mxu1 %v3956_v28  ;;  %3319 = vmatprep.subr.bf16.mxu0 %v3965_v3  ;;  %v3989_v28 = vld [vmem:[#allocation7 + $0x108] sm:$0xff]  }
  0xb0   : > { %3208 = vmatpush3.bf16.msra.mxu1 %v3957_v37  ;;  %3320 = vmatpush3.bf16.msra.mxu0 %v3967_v5  ;;  %v4001_v37 = vld [vmem:[#allocation7 + $0x128] sm:$0xff]  }
  0xb1   : > { %3209 = vmatprep.subr.bf16.mxu1 %v3958_v60  ;;  %3321 = vmatprep.subr.bf16.mxu0 %v3969_v7 }
  0xb2   : > { %3722 = vmatmul.mubr.bf16.gmra.mrb[4].mxu0 %v377_v38  ;;  %3738 = vmatmul.mubr.bf16.gmra.mrb[4].mxu1 %v385_v39  ;;  %v4004_v38 = vld [vmem:[#allocation7 + $0x170] sm:$0xff]   ;;  %v4568_v39 = vld [vmem:[%s5967_s2] ss:$0 sm:$0xff] }
  0xb3   : > { %3725 = vmatprep.mubr.bf16.mxu0 %v378_v40  ;;  %3741 = vmatprep.mubr.bf16.mxu1 %v386_v41  ;;  %v654_v40 = vlaneseq }
  0xb4   : > { %3210 = vmatpush3.bf16.msra.mxu1 %v3959_v61  ;;  %3322 = vmatpush3.bf16.msra.mxu0 %v3971_v9 }
  0xb5   : > { %3211 = vmatprep.subr.bf16.mxu1 %v3960_v62  ;;  %3323 = vmatprep.subr.bf16.mxu0 %v3973_v11 }
  0xb8   : > { %3212 = vmatpush3.bf16.msra.mxu1 %v3962_v0  ;;  %3324 = vmatpush3.bf16.msra.mxu0 %v3975_v13 }
  0xb9   : > { %3213 = vmatprep.subr.bf16.mxu1 %v3964_v2  ;;  %3325 = vmatprep.subr.bf16.mxu0 %v3977_v15 }
  0xba   : > { %3726 = vmatmul.mubr.bf16.gmra.mrb[8].mxu0 %v379_v50  ;;  %3742 = vmatmul.mubr.bf16.gmra.mrb[8].mxu1 %v387_v51 }
  0xbb   : > { %3729 = vmatprep.mubr.bf16.mxu0 %v380_v52  ;;  %3745 = vmatprep.mubr.bf16.mxu1 %v388_v53  ;;  %v4574_v52 = vshrl.u32 %v654_v40, 7 }
  0xbc   : > { %3214 = vmatpush3.bf16.msra.mxu1 %v3966_v4  ;;  %3326 = vmatpush3.bf16.msra.mxu0 %v3979_v17 }
  0xbd   : > { %3215 = vmatprep.subr.bf16.mxu1 %v3968_v6  ;;  %3327 = vmatprep.subr.bf16.mxu0 %v3980_v18  ;;  %v4591_v0 = vadd.s32 8, %v4574_v52  ;;  %vm692_vm0 = vcmp.lt.s32.totalorder %v4574_v52, 1  ;;  %vm819_vm1 = vcmp.lt.s32.totalorder %v4574_v52, 7  ;;  %vm657_vm2 = vcmp.ge.s32.totalorder %v4574_v52, 1  ;;  %v4017_v52 = vld [vmem:[#allocation7 + $0x1f8] sm:$0xff]  }
  0xbe   : > { %vm4816_vm5 = vmpackc.low %vm4265_vm4, %vm657_vm2 }
  0xbf   : > { %vm660_vm3 = vcmp.le.s32.totalorder %v4591_v0, 14 }
  0xc0   : > { %3216 = vmatpush3.bf16.msra.mxu1 %v3970_v8  ;;  %3328 = vmatpush3.bf16.msra.mxu0 %v3981_v20  ;;  %vm4969_vm6 = vmpackc.low %vm660_vm3, %vm4265_vm4 }
  0xc1   : > { %3217 = vmatprep.subr.bf16.mxu1 %v3972_v10  ;;  %3329 = vmatprep.subr.bf16.mxu0 %v3984_v21 }
  0xc2   : > { %3730 = vmatmul.mubr.bf16.gmra.mrb[12].mxu0 %v381_v58  ;;  %3746 = vmatmul.mubr.bf16.gmra.mrb[12].mxu1 %v389_v59 }
  0xc3   : > { %1527 = vmatprep.mubr.bf16.mxu1 %v5977_v19 }
  0xc4   : > { %3218 = vmatpush3.bf16.msra.mxu1 %v3974_v12  ;;  %3330 = vmatpush3.bf16.msra.mxu0 %v3985_v22 }
  0xc5   : > { %3219 = vmatprep.subr.bf16.mxu1 %v3976_v14  ;;  %3331 = vmatprep.subr.bf16.mxu0 %v3986_v23 }
  0xc8   : > { %3220 = vmatpush3.bf16.msra.mxu1 %v3978_v16  ;;  %3332 = vmatpush3.bf16.msra.mxu0 %v3987_v26 }
  0xc9   : > { %3429 = vmatprep.subr.bf16.mxu1 %v3982_v24  ;;  %3541 = vmatprep.subr.bf16.mxu0 %v3994_v33 }
  0xcb   : > { %1528 = vmatmul.mubr.bf16.vlgmr.msra.gmra.mrb[16].mxu1 %v5977_v19  ;;  %v4728_v19 = vld [vmem:[#allocation7 + $0x200] sm:$0xff]  }
  0xcc   : > { %3430 = vmatpush3.bf16.msra.mxu1 %v3983_v25 }
  0xcd   : > { %3431 = vmatprep.subr.bf16.mxu1 %v3988_v27 }
  0xd0   : > { %3432 = vmatpush3.bf16.msra.mxu1 %v3989_v28 }
  0xd1   : > { %3433 = vmatprep.subr.bf16.mxu1 %v3990_v29 }
  0xd4   : > { %3434 = vmatpush3.bf16.msra.mxu1 %v3991_v30 }
  0xd5   : > { %3435 = vmatprep.subr.bf16.mxu1 %v3992_v31 }
  0xd8   : > { %3436 = vmatpush3.bf16.msra.mxu1 %v3993_v32 }
  0xd9   : > { %3437 = vmatprep.subr.bf16.mxu1 %v3996_v34 }
  0xdc   : > { %3438 = vmatpush3.bf16.msra.mxu1 %v3997_v35 }
  0xdd   : > { %3439 = vmatprep.subr.bf16.mxu1 %v4000_v36 }
  0xe0   : > { %3440 = vmatpush3.bf16.msra.mxu1 %v4001_v37 }
  0xe1   : > { %3441 = vmatprep.subr.bf16.mxu1 %v4004_v38  ;;  %v4008_v38 = vld [vmem:[#allocation7 + $0x178] sm:$0xff]  }
  0xe4   : > { %3442 = vmatpush3.bf16.msra.mxu1 %v4005_v43 }
  0xe5   : > { %3443 = vmatprep.subr.bf16.mxu1 %v4008_v38 }
 0x17d   : > { %v3735_v41 = vpop.f32.mrb[0].mxu1  ;;  %v3719_v42 = vpop.f32.mrb[0].mxu0 }
 0x17e   : > { %v568_v44 = vadd.f32 %v3735_v41, %v4568_v39  ;;  %v559_v45 = vpop.f32.mrb[1].mxu1  ;;  %v504_v46 = vadd.f32 %v3719_v42, %v4568_v39  ;;  %v495_v47 = vpop.f32.mrb[1].mxu0 }
 0x17f   : > { %v560_v48 = vadd.f32 %v4568_v39, %v559_v45  ;;  %v3736_v49 = vpop.f32.mrb[2].mxu1  ;;  %v496_v50 = vadd.f32 %v4568_v39, %v495_v47  ;;  %v3720_v51 = vpop.f32.mrb[2].mxu0 }
 0x180   : > { %v4576_v53 = vmax.f32 %v568_v44, 0.0  ;;  %v571_v54 = vadd.f32 %v3736_v49, %v4568_v39  ;;  %v562_v55 = vpop.f32.mrb[3].mxu1  ;;  %v4579_v56 = vmax.f32 %v504_v46, 0.0  ;;  %v507_v57 = vadd.f32 %v3720_v51, %v4568_v39  ;;  %v498_v58 = vpop.f32.mrb[3].mxu0 }
 0x181   : > { %v4582_v59 = vmax.f32 %v560_v48, 0.0  ;;  %v563_v60 = vadd.f32 %v4568_v39, %v562_v55  ;;  %v4585_v61 = vmax.f32 %v496_v50, 0.0  ;;  %v499_v62 = vadd.f32 %v4568_v39, %v498_v58 }
 0x182   : > { %v4588_v63 = vmax.f32 %v571_v54, 0.0  ;;  %v663_v4 = vrot.slane %v4579_v56, 7  ;;  %v790_v8 = vrot.slane %v4579_v56, 1  ;;  %v4604_v12 = vmax.f32 %v507_v57, 0.0 }
 0x183   : > { %v4595_v3 = vmax.f32 %v563_v60, 0.0  ;;  %v661_v11 = vrot.slane %v4585_v61, 7  ;;  %v4606_v13 = vmax.f32 %v499_v62, 0.0  ;;  %v5979_v26 = vrot.slane %v4585_v61, 1 }
 0x184   : > { %v4616_v21 = vpack.c.bf16 %v4588_v63, %v4576_v53  ;;  %v664_v31 = vrot.slane %v4604_v12, 7  ;;  %v791_v41 = vrot.slane %v4604_v12, 1 }
 0x185   : > { %v3739_v10 = vpop.f32.mrb[4].mxu1  ;;  %v3723_v14 = vpop.f32.mrb[4].mxu0  ;;  %v4612_v20 = vpack.c.bf16 %v4595_v3, %v4582_v59  ;;  %v662_v42 = vrot.slane %v4606_v13, 7  ;;  %v789_v43 = vrot.slane %v4606_v13, 1  ;;  %v4654_v62 = vpack.c.bf16 %v4606_v13, %v4585_v61 }
 0x186   : > { %v584_v15 = vadd.f32 %v3739_v10, %v4568_v39  ;;  %v575_v16 = vpop.f32.mrb[5].mxu1  ;;  %v520_v17 = vadd.f32 %v3723_v14, %v4568_v39  ;;  %v511_v18 = vpop.f32.mrb[5].mxu0  ;;  %v4009_v10 = vld [vmem:[#allocation7 + $0x138] sm:$0xff]  }
 0x187   : > { %v576_v24 = vadd.f32 %v4568_v39, %v575_v16  ;;  %v3740_v25 = vpop.f32.mrb[6].mxu1  ;;  %v3724_v27 = vpop.f32.mrb[6].mxu0  ;;  %v512_v36 = vadd.f32 %v4568_v39, %v511_v18  ;;  %1535 = vmatprep.mubr.bf16.mxu1 %v4654_v62  ;;  %3444 = vmatpush3.bf16.msra.mxu1 %v4009_v10 }
 0x188   : > { %v4622_v28 = vmax.f32 %v584_v15, 0.0  ;;  %v587_v29 = vadd.f32 %v3740_v25, %v4568_v39  ;;  %v578_v30 = vpop.f32.mrb[7].mxu1  ;;  %v4626_v32 = vmax.f32 %v520_v17, 0.0  ;;  %v514_v33 = vpop.f32.mrb[7].mxu0  ;;  %v523_v37 = vadd.f32 %v3724_v27, %v4568_v39  ;;  %3749 = vmatprep.subr.bf16.mxu1 %v4728_v19 }
 0x189   : > { %v4628_v34 = vmax.f32 %v576_v24, 0.0  ;;  %v579_v35 = vadd.f32 %v4568_v39, %v578_v30  ;;  %v4646_v51 = vmax.f32 %v512_v36, 0.0  ;;  %v515_v58 = vadd.f32 %v4568_v39, %v514_v33 }
 0x18a   : > { %v4633_v40 = vmax.f32 %v587_v29, 0.0  ;;  %v667_v47 = vrot.slane %v4626_v32, 7  ;;  %v4649_v57 = vmax.f32 %v523_v37, 0.0 }
 0x18b   : > { %v4640_v46 = vmax.f32 %v579_v35, 0.0  ;;  %v665_v25 = vrot.slane %v4646_v51, 7  ;;  %v4663_v30 = vmax.f32 %v515_v58, 0.0  ;;  %v792_v37 = vrot.slane %v4646_v51, 1 }
 0x18c   : > { %v668_v58 = vrot.slane %v4649_v57, 7 }
 0x18d   : > { %v3743_v55 = vpop.f32.mrb[8].mxu1  ;;  %v3727_v60 = vpop.f32.mrb[8].mxu0  ;;  %v666_v10 = vrot.slane %v4663_v30, 7 }
 0x18e   : > { %v600_v17 = vadd.f32 %v3743_v55, %v4568_v39  ;;  %v591_v18 = vpop.f32.mrb[9].mxu1  ;;  %v527_v24 = vpop.f32.mrb[9].mxu0  ;;  %v536_v33 = vadd.f32 %v3727_v60, %v4568_v39 }
 0x18f   : > { %v592_v27 = vadd.f32 %v4568_v39, %v591_v18  ;;  %v3744_v29 = vpop.f32.mrb[10].mxu1  ;;  %v3728_v35 = vpop.f32.mrb[10].mxu0  ;;  %v528_v14 = vadd.f32 %v4568_v39, %v527_v24 }
 0x190   : > { %v4667_v36 = vmax.f32 %v600_v17, 0.0  ;;  %v603_v38 = vadd.f32 %v3744_v29, %v4568_v39  ;;  %v594_v55 = vpop.f32.mrb[11].mxu1  ;;  %v530_v16 = vpop.f32.mrb[11].mxu0  ;;  %v4680_v17 = vmax.f32 %v536_v33, 0.0  ;;  %v539_v29 = vadd.f32 %v3728_v35, %v4568_v39 }
 0x191   : > { %v4672_v18 = vmax.f32 %v592_v27, 0.0  ;;  %v595_v45 = vadd.f32 %v4568_v39, %v594_v55  ;;  %v4691_v48 = vmax.f32 %v528_v14, 0.0  ;;  %v531_v55 = vadd.f32 %v4568_v39, %v530_v16 }
 0x192   : > { %v4677_v44 = vmax.f32 %v603_v38, 0.0  ;;  %v4698_v23 = vmax.f32 %v539_v29, 0.0  ;;  %v721_v16 = vsel %vm692_vm0, %v661_v11, %v662_v42 }
 0x193   : > { %v4686_v9 = vmax.f32 %v595_v45, 0.0 }
 0x195   : > { %v3731_v45 = vpop.f32.mrb[12].mxu0  ;;  %v3747_v15 = vpop.f32.mrb[12].mxu1 }
 0x196   : > { %v552_v38 = vadd.f32 %v3731_v45, %v4568_v39  ;;  %v616_v14 = vadd.f32 %v3747_v15, %v4568_v39  ;;  %v543_v49 = vpop.f32.mrb[13].mxu0  ;;  %v607_v2 = vpop.f32.mrb[13].mxu1  ;;  %v4714_v15 = vpack.c.bf16 %v4604_v12, %v4579_v56  ;;  %v716_v56 = vsel %vm692_vm0, %v666_v10, %v667_v47 }
 0x197   : > { %v544_v33 = vadd.f32 %v4568_v39, %v543_v49  ;;  %v608_v35 = vadd.f32 %v4568_v39, %v607_v2  ;;  %v3732_v1 = vpop.f32.mrb[14].mxu0  ;;  %v3748_v7 = vpop.f32.mrb[14].mxu1  ;;  %v4718_v2 = vmax.f32 %v531_v55, 0.0 }
 0x198   : > { %6004 = vst [vmem:[#allocation16_spill] sm:$0xff] %v4714_v15  ;;  %v4720_v45 = vmax.f32 %v552_v38, 0.0  ;;  %v610_v6 = vpop.f32.mrb[15].mxu1  ;;  %v546_v5 = vpop.f32.mrb[15].mxu0  ;;  %v4723_v54 = vmax.f32 %v616_v14, 0.0  ;;  %v555_v60 = vadd.f32 %v3732_v1, %v4568_v39  ;;  %v619_v49 = vadd.f32 %v3748_v7, %v4568_v39 }
 0x199   : > { %v4725_v24 = vmax.f32 %v544_v33, 0.0  ;;  %v670_v55 = vrot.slane %v4718_v2, 7  ;;  %v4733_v38 = vmax.f32 %v608_v35, 0.0  ;;  %v797_v27 = vrot.slane %v4718_v2, 1 }
 0x19a   : > { %v4742_v50 = vmax.f32 %v555_v60, 0.0  ;;  %v611_v35 = vadd.f32 %v4568_v39, %v610_v6  ;;  %v719_v14 = vsel %vm692_vm0, %v663_v4, %v664_v31  ;;  %v720_v33 = vsel %vm692_vm0, %v662_v42, %v663_v4 }
 0x19b   : > { %v848_v6 = vsel %vm819_vm1, %v789_v43, %v790_v8  ;;  %v800_v7 = vrot.slane %v4725_v24, 1  ;;  %v4766_v1 = vmax.f32 %v619_v49, 0.0  ;;  %v4768_v22 = vpack.c.bf16 %v719_v14, %v720_v33 }
 0x19c   : > { %v849_v4 = vsel %vm819_vm1, %v5979_v26, %v789_v43  ;;  %v4779_v42 = vpack.c.bf16 %v4663_v30, %v4646_v51  ;;  %v717_v49 = vsel %vm692_vm0, %v665_v25, %v666_v10  ;;  %v718_v43 = vsel %vm692_vm0, %v664_v31, %v665_v25 }
 0x19d   : > { %6005 = vst [vmem:[#allocation17_spill] sm:$0xff] %v4768_v22  ;;  %v5980_v13 = vrot.slane %v4766_v1, 7  ;;  %v4790_v33 = vpack.c.bf16 %v848_v6, %v849_v4  ;;  %v4799_v29 = vmax.f32 %v611_v35, 0.0  ;;  %v4801_v60 = vpack.c.bf16 %v717_v49, %v718_v43 }
 0x19e   : > { %6006 = vst [vmem:[#allocation18_spill] sm:$0xff] %v4779_v42  ;;  %v4805_v14 = vpack.c.bf16 %v4649_v57, %v4626_v32  ;;  %v846_v25 = vsel %vm819_vm1, %v791_v41, %v792_v37  ;;  %v715_v35 = vsel %vm692_vm0, %v667_v47, %v668_v58  ;;  %v547_v12 = vadd.f32 %v4568_v39, %v546_v5  ;;  %v3998_v5 = vld [vmem:[#allocation7 + $0x1c8] sm:$0xff]  }
 0x19f   : > { %6007 = vst [vmem:[#allocation19_spill] sm:$0xff] %v4801_v60  ;;  %v722_v6 = vsel %vm692_vm0, %v5980_v13, %v661_v11  ;;  %v847_v11 = vsel %vm819_vm1, %v790_v8, %v791_v41  ;;  %v3995_v8 = vld [vmem:[#allocation7 + $0x180] sm:$0xff]   ;;  %v4847_v41 = vpack.c.bf16 %v715_v35, %v716_v56  ;;  %v6011_v43 = vrot.slane %v4626_v32, 1 }
 0x1a0   : > { %6008 = vst [vmem:[#allocation20_spill] sm:$0xff] %v4805_v14  ;;  %v2890_v4 = vpack.c.bf16 %v721_v16, %v722_v6  ;;  %v4838_v49 = vpack.c.bf16 %v846_v25, %v847_v11  ;;  %v6012_v13 = vrot.slane %v4663_v30, 1  ;;  %v4863_v39 = vpack.c.bf16 %v4718_v2, %v4691_v48 }
 0x1a1   : > { %v635_v47 = vmax.f32 %v547_v12, 0.0  ;;  %v6014_v51 = vrot.slane %v4691_v48, 7  ;;  %v6016_v35 = vmov 0.0|0.0   ;;  %v4890_v56 = vpack.c.bf16 %v4698_v23, %v4680_v17 }
 0x1a2   : > { %v844_v16 = vsel %vm819_vm1, %v6012_v13, %v6011_v43  ;;  %v6013_v6 = vmov %v6012_v13  ;;  %2891 = vmatmul.mubr.msk.bf16.gmra.mrb[20].mxu1 %vm4816_vm5, %v2890_v4  ;;  %2936 = vmatprep.mubr.msk.bf16.mxu0 %vm4816_vm5, %v2890_v4  ;;  %v6017_v12 = vrot.slane %v4691_v48, 1  ;;  %v6018_v43 = vrot.slane %v4649_v57, 1 }
 0x1a3   : > { %v845_v25 = vsel %vm819_vm1, %v792_v37, %v6013_v6  ;;  %v713_v30 = vsel %vm692_vm0, %v6014_v51, %v670_v55  ;;  %v6015_v37 = vmov %v6014_v51  ;;  %1543 = vmatprep.mubr.bf16.mxu1 %v4714_v15  ;;  %1689 = vmatmul.mubr.bf16.vlgmr.msra.gmra.mrb[16].mxu0 %v6016_v35  ;;  %v801_v6 = vrot.slane %v635_v47, 1 }
 0x1a4   : > { %v4869_v10 = vpack.c.bf16 %v844_v16, %v845_v25  ;;  %v714_v13 = vsel %vm692_vm0, %v668_v58, %v6015_v37  ;;  %v842_v16 = vsel %vm819_vm1, %v6018_v43, %v6017_v12  ;;  %2939 = vmatprep.mubr.msk.bf16.mxu0 %vm4816_vm5, %v4768_v22  ;;  %v674_v58 = vrot.slane %v635_v47, 7  ;;  %3542 = vmatpush3.bf16.msra.mxu0 %v3995_v8 }
 0x1a5   : > { %v4886_v4 = vpack.c.bf16 %v713_v30, %v714_v13  ;;  %v6019_v25 = vmov %v6018_v43  ;;  %v6020_v51 = vrot.slane %v4626_v32, 1  ;;  %v6021_v37 = vrot.slane %v4698_v23, 7  ;;  %v3999_v43 = vld [vmem:[#allocation7 + $0x188] sm:$0xff]   ;;  %3543 = vmatprep.subr.bf16.mxu0 %v3998_v5 }
 0x1a6   : > { %v6022_v13 = vrot.slane %v4680_v17, 7  ;;  %v6024_v57 = vrot.slane %v4680_v17, 1  ;;  %v6025_v8 = vrot.slane %v4691_v48, 1  ;;  %v6028_v48 = vrot.slane %v4698_v23, 7 }
 0x1a7   : > { %v843_v30 = vsel %vm819_vm1, %v6020_v51, %v6019_v25  ;;  %v4002_v51 = vld [vmem:[#allocation7 + $0x1d0] sm:$0xff]   ;;  %v4952_v5 = vpack.c.bf16 %v4742_v50, %v4720_v45  ;;  %v6077_v35 = vrot.slane %v4667_v36, 7 }
 0x1a8   : > { %v711_v12 = vsel %vm692_vm0, %v6022_v13, %v6021_v37  ;;  %v4913_v11 = vpack.c.bf16 %v842_v16, %v843_v30  ;;  %v6023_v26 = vmov %v6022_v13  ;;  %v840_v25 = vsel %vm819_vm1, %v797_v27, %v6024_v57  ;;  %3544 = vmatpush3.bf16.msra.mxu0 %v3999_v43  ;;  %v4003_v43 = vld [vmem:[#allocation7 + $0x190] sm:$0xff]  }
 0x1a9   : > { %v712_v32 = vsel %vm692_vm0, %v670_v55, %v6023_v26  ;;  %v841_v16 = vsel %vm819_vm1, %v6025_v8, %v797_v27  ;;  %v4938_v26 = vpack.c.bf16 %v635_v47, %v4725_v24  ;;  %v6026_v55 = vrot.slane %v4725_v24, 7  ;;  %3545 = vmatprep.subr.bf16.mxu0 %v4002_v51 }
 0x1aa   : > { %v4933_v30 = vpack.c.bf16 %v711_v12, %v712_v32  ;;  %v4935_v37 = vpack.c.bf16 %v840_v25, %v841_v16  ;;  %v6029_v47 = vrot.slane %v4698_v23, 1  ;;  %v6034_v23 = vrot.slane %v4720_v45, 7  ;;  %2894 = vmatmul.mubr.msk.bf16.gmra.mrb[24].mxu1 %vm4816_vm5, %v4768_v22 }
 0x1ab   : > { %v709_v13 = vsel %vm692_vm0, %v6026_v55, %v674_v58  ;;  %v6027_v2 = vmov %v6026_v55  ;;  %2942 = vmatmul.mubr.msk.bf16.gmra.mrb[20].mxu0 %vm4969_vm6, %v4790_v33  ;;  %1551 = vmatprep.mubr.bf16.mxu1 %v4779_v42  ;;  %v6087_v22 = vrot.slane %v4677_v44, 7 }
 0x1ac   : > { %v710_v27 = vsel %vm692_vm0, %v6028_v48, %v6027_v2  ;;  %v838_v12 = vsel %vm819_vm1, %v6029_v47, %v800_v7  ;;  %v6030_v32 = vmov %v6029_v47  ;;  %v6033_v2 = vrot.slane %v4742_v50, 7  ;;  %2945 = vmatprep.mubr.msk.bf16.mxu0 %vm4816_vm5, %v4801_v60  ;;  %3546 = vmatpush3.bf16.msra.mxu0 %v4003_v43 }
 0x1ad   : > { %v839_v25 = vsel %vm819_vm1, %v6024_v57, %v6030_v32  ;;  %v4973_v16 = vpack.c.bf16 %v709_v13, %v710_v27  ;;  %v6035_v48 = vmov %v6034_v23  ;;  %v6036_v13 = vrot.slane %v4720_v45, 1 }
 0x1ae   : > { %v4975_v55 = vpack.c.bf16 %v838_v12, %v839_v25  ;;  %v707_v17 = vsel %vm692_vm0, %v6034_v23, %v6033_v2  ;;  %v708_v0 = vsel %vm692_vm0, %v674_v58, %v6035_v48  ;;  %v837_v12 = vsel %vm819_vm1, %v800_v7, %v801_v6 }
 0x1af   : > { %v4987_v47 = vpack.c.bf16 %v707_v17, %v708_v0  ;;  %v836_v27 = vsel %vm819_vm1, %v801_v6, %v6036_v13  ;;  %v6037_v32 = vrot.slane %v4595_v3, 7  ;;  %v6038_v57 = vrot.slane %v4582_v59, 7 }
 0x1b0   : > { %v5006_v25 = vpack.c.bf16 %v836_v27, %v837_v12  ;;  %v6040_v6 = vrot.slane %v4582_v59, 1  ;;  %v6041_v23 = vrot.slane %v4742_v50, 1  ;;  %v6043_v48 = vmov %v6036_v13  ;;  %v4006_v13 = vld [vmem:[#allocation7 + $0x1d8] sm:$0xff]  }
 0x1b1   : > { %v705_v58 = vsel %vm692_vm0, %v6038_v57, %v6037_v32  ;;  %v6039_v24 = vmov %v6038_v57  ;;  %v6044_v50 = vrot.slane %v4588_v63, 7  ;;  %v6045_v45 = vrot.slane %v4576_v53, 7  ;;  %3547 = vmatprep.subr.bf16.mxu0 %v4006_v13 }
 0x1b2   : > { %v706_v7 = vsel %vm692_vm0, %v6033_v2, %v6039_v24  ;;  %v834_v51 = vsel %vm819_vm1, %v6041_v23, %v6040_v6  ;;  %v6042_v17 = vmov %v6041_v23  ;;  %v6047_v2 = vrot.slane %v4595_v3, 7  ;;  %2897 = vmatmul.mubr.msk.bf16.gmra.mrb[28].mxu1 %vm4816_vm5, %v4801_v60 }
 0x1b3   : > { %v835_v0 = vsel %vm819_vm1, %v6043_v48, %v6042_v17  ;;  %v5031_v12 = vpack.c.bf16 %v705_v58, %v706_v7  ;;  %v703_v57 = vsel %vm692_vm0, %v6045_v45, %v6044_v50  ;;  %v6046_v24 = vmov %v6045_v45  ;;  %1559 = vmatprep.mubr.bf16.mxu1 %v4805_v14 }
 0x1b4   : > { %v5033_v32 = vpack.c.bf16 %v834_v51, %v835_v0  ;;  %v704_v58 = vsel %vm692_vm0, %v6047_v2, %v6046_v24  ;;  %v5052_v7 = vpack.c.bf16 %v4640_v46, %v4628_v34  ;;  %v6048_v6 = vrot.slane %v4576_v53, 1  ;;  %2948 = vmatmul.mubr.msk.bf16.gmra.mrb[24].mxu0 %vm4969_vm6, %v4838_v49 }
 0x1b5   : > { %v6049_v23 = vrot.slane %v4595_v3, 1  ;;  %v6051_v48 = vrot.slane %v4582_v59, 1  ;;  %v5066_v50 = vpack.c.bf16 %v703_v57, %v704_v58  ;;  %v6052_v24 = vrot.slane %v4640_v46, 7  ;;  %2951 = vmatprep.mubr.msk.bf16.mxu0 %vm4816_vm5, %v4847_v41 }
 0x1b6   : > { %v6053_v2 = vrot.slane %v4628_v34, 7  ;;  %v6055_v3 = vrot.slane %v4588_v63, 7  ;;  %v5086_v58 = vpack.c.bf16 %v4633_v40, %v4622_v28  ;;  %v6085_v14 = vrot.slane %v4733_v38, 7 }
 0x1b7   : > { %v832_v51 = vsel %vm819_vm1, %v6049_v23, %v6048_v6  ;;  %v6050_v17 = vmov %v6049_v23  ;;  %v4007_v23 = vld [vmem:[#allocation7 + $0x198] sm:$0xff]  }
 0x1b8   : > { %v833_v0 = vsel %vm819_vm1, %v6051_v48, %v6050_v17  ;;  %v701_v27 = vsel %vm692_vm0, %v6053_v2, %v6052_v24  ;;  %v6054_v6 = vmov %v6053_v2  ;;  %v6057_v17 = vrot.slane %v4588_v63, 1  ;;  %3548 = vmatpush3.bf16.msra.mxu0 %v4007_v23 }
 0x1b9   : > { %v5068_v45 = vpack.c.bf16 %v832_v51, %v833_v0  ;;  %v702_v59 = vsel %vm692_vm0, %v6055_v3, %v6054_v6  ;;  %v6056_v51 = vrot.slane %v4628_v34, 1  ;;  %v6059_v24 = vrot.slane %v4576_v53, 1 }
 0x1ba   : > { %v5082_v57 = vpack.c.bf16 %v701_v27, %v702_v59  ;;  %v6058_v0 = vmov %v6057_v17  ;;  %v6060_v2 = vrot.slane %v4633_v40, 7  ;;  %v6061_v6 = vrot.slane %v4622_v28, 7  ;;  %2900 = vmatmul.mubr.msk.bf16.gmra.mrb[32].mxu1 %vm4816_vm5, %v4847_v41 }
 0x1bb   : > { %v830_v48 = vsel %vm819_vm1, %v6057_v17, %v6056_v51  ;;  %v831_v43 = vsel %vm819_vm1, %v6059_v24, %v6058_v0  ;;  %v6063_v51 = vrot.slane %v4640_v46, 7  ;;  %v5116_v63 = vpack.c.bf16 %v4686_v9, %v4672_v18  ;;  %1567 = vmatprep.mubr.bf16.mxu1 %v4863_v39 }
 0x1bc   : > { %v5100_v27 = vpack.c.bf16 %v830_v48, %v831_v43  ;;  %v699_v3 = vsel %vm692_vm0, %v6061_v6, %v6060_v2  ;;  %v6062_v59 = vmov %v6061_v6  ;;  %v6064_v17 = vrot.slane %v4622_v28, 1  ;;  %2954 = vmatmul.mubr.msk.bf16.gmra.mrb[28].mxu0 %vm4969_vm6, %v4869_v10 }
 0x1bd   : > { %v700_v53 = vsel %vm692_vm0, %v6063_v51, %v6062_v59  ;;  %v6065_v48 = vrot.slane %v4640_v46, 1  ;;  %v6067_v43 = vrot.slane %v4628_v34, 1  ;;  %v6068_v6 = vrot.slane %v4686_v9, 7  ;;  %2957 = vmatprep.mubr.msk.bf16.mxu0 %vm4816_vm5, %v4886_v4 }
 0x1be   : > { %v5118_v13 = vpack.c.bf16 %v699_v3, %v700_v53  ;;  %v6069_v59 = vrot.slane %v4672_v18, 7  ;;  %v5148_v34 = vpack.c.bf16 %v4677_v44, %v4667_v36  ;;  %v6086_v42 = vmov %v6085_v14 }
 0x1bf   : > { %v828_v0 = vsel %vm819_vm1, %v6065_v48, %v6064_v17  ;;  %v6066_v24 = vmov %v6065_v48  ;;  %v6071_v17 = vrot.slane %v4633_v40, 7  ;;  %v6072_v48 = vrot.slane %v4672_v18, 1 }
 0x1c0   : > { %v829_v2 = vsel %vm819_vm1, %v6067_v43, %v6066_v24  ;;  %v697_v3 = vsel %vm692_vm0, %v6069_v59, %v6068_v6  ;;  %v6070_v53 = vmov %v6069_v59  ;;  %v6073_v24 = vrot.slane %v4633_v40, 1  ;;  %v4011_v40 = vld [vmem:[#allocation7 + $0x1a0] sm:$0xff]  }
 0x1c1   : > { %v5138_v51 = vpack.c.bf16 %v828_v0, %v829_v2  ;;  %v698_v46 = vsel %vm692_vm0, %v6071_v17, %v6070_v53  ;;  %v4010_v0 = vld [vmem:[#allocation7 + $0x1e0] sm:$0xff]   ;;  %v6075_v59 = vrot.slane %v4622_v28, 1  ;;  %v6076_v17 = vrot.slane %v4677_v44, 7 }
 0x1c2   : > { %v826_v43 = vsel %vm819_vm1, %v6073_v24, %v6072_v48  ;;  %v5159_v2 = vpack.c.bf16 %v697_v3, %v698_v46  ;;  %v6074_v6 = vmov %v6073_v24  ;;  %v6078_v48 = vmov %v6077_v35  ;;  %3549 = vmatprep.subr.bf16.mxu0 %v4010_v0  ;;  %2903 = vmatmul.mubr.msk.bf16.gmra.mrb[36].mxu1 %vm4816_vm5, %v4886_v4 }
 0x1c3   : > { %v827_v53 = vsel %vm819_vm1, %v6075_v59, %v6074_v6  ;;  %v695_v23 = vsel %vm692_vm0, %v6077_v35, %v6076_v17  ;;  %v6079_v24 = vrot.slane %v4686_v9, 7  ;;  %v906_v28 = vrot.slane %v4766_v1, 1  ;;  %v4012_v59 = vld [vmem:[#allocation7 + $0x1e8] sm:$0xff]   ;;  %3550 = vmatpush3.bf16.msra.mxu0 %v4011_v40  ;;  %1575 = vmatprep.mubr.bf16.mxu1 %v4890_v56 }
 0x1c4   : > { %v5184_v46 = vpack.c.bf16 %v826_v43, %v827_v53  ;;  %v5190_v35 = vpack.c.bf16 %v4799_v29, %v4733_v38  ;;  %v6080_v17 = vrot.slane %v4667_v36, 1  ;;  %v6083_v53 = vrot.slane %v4672_v18, 1  ;;  %3551 = vmatprep.subr.bf16.mxu0 %v4012_v59  ;;  %v4015_v59 = vld [vmem:[#allocation7 + $0x1f0] sm:$0xff]   ;;  %2960 = vmatmul.mubr.msk.bf16.gmra.mrb[32].mxu0 %vm4969_vm6, %v4913_v11 }
 0x1c5   : > { %v696_v3 = vsel %vm692_vm0, %v6079_v24, %v6078_v48  ;;  %v6081_v48 = vrot.slane %v4686_v9, 1  ;;  %v6096_v0 = vrot.slane %v4723_v54, 1  ;;  %2963 = vmatprep.mubr.msk.bf16.mxu0 %vm4816_vm5, %v4933_v30 }
 0x1c6   : > { %v5186_v6 = vpack.c.bf16 %v695_v23, %v696_v3  ;;  %v6084_v3 = vrot.slane %v4799_v29, 7 }
 0x1c7   : > { %v824_v24 = vsel %vm819_vm1, %v6081_v48, %v6080_v17  ;;  %v6082_v43 = vmov %v6081_v48  ;;  %v694_v17 = vsel %vm692_vm0, %v6087_v22, %v6086_v42  ;;  %v6088_v48 = vrot.slane %v4733_v38, 1 }
 0x1c8   : > { %v825_v23 = vsel %vm819_vm1, %v6083_v53, %v6082_v43  ;;  %v693_v60 = vsel %vm692_vm0, %v6085_v14, %v6084_v3  ;;  %v6089_v43 = vrot.slane %v4677_v44, 1  ;;  %v6091_v3 = vrot.slane %v4667_v36, 1  ;;  %v4013_v36 = vld [vmem:[#allocation7 + $0x1a8] sm:$0xff]  }
 0x1c9   : > { %v5219_v9 = vpack.c.bf16 %v824_v24, %v825_v23  ;;  %v5221_v18 = vpack.c.bf16 %v693_v60, %v694_v17  ;;  %v6092_v60 = vrot.slane %v4766_v1, 7  ;;  %v6093_v42 = vrot.slane %v4723_v54, 7  ;;  %3552 = vmatpush3.bf16.msra.mxu0 %v4013_v36 }
 0x1ca   : > { %v822_v53 = vsel %vm819_vm1, %v6089_v43, %v6088_v48  ;;  %v6090_v14 = vmov %v6089_v43  ;;  %v6095_v17 = vrot.slane %v4799_v29, 7  ;;  %v6100_v40 = vmov %v6096_v0  ;;  %3553 = vmatprep.subr.bf16.mxu0 %v4015_v59  ;;  %2906 = vmatmul.mubr.msk.bf16.gmra.mrb[40].mxu1 %vm4816_vm5, %v4933_v30 }
 0x1cb   : > { %v823_v15 = vsel %vm819_vm1, %v6091_v3, %v6090_v14  ;;  %v900_v24 = vsel %vm692_vm0, %v6093_v42, %v6092_v60  ;;  %v6094_v23 = vmov %v6093_v42  ;;  %v6099_v14 = vrot.slane %v4733_v38, 1  ;;  %v4016_v38 = vld [vmem:[#allocation7 + $0x1b0] sm:$0xff]   ;;  %1583 = vmatprep.mubr.bf16.mxu1 %v4938_v26 }
 0x1cc   : > { %v5235_v22 = vpack.c.bf16 %v822_v53, %v823_v15  ;;  %v901_v44 = vsel %vm692_vm0, %v6095_v17, %v6094_v23  ;;  %v6097_v15 = vrot.slane %v4799_v29, 1  ;;  %v907_v60 = vsel %vm819_vm1, %v6100_v40, %v906_v28  ;;  %2966 = vmatmul.mubr.msk.bf16.gmra.mrb[36].mxu0 %vm4969_vm6, %v4935_v37  ;;  %v6105_v40 = vld [vmem:[#allocation19_spill] sm:$0xff] }
 0x1cd   : > { %v5255_v43 = vpack.c.bf16 %v900_v24, %v901_v44  ;;  %v6101_v42 = vrot.slane %v4585_v61, 1  ;;  %v5277_v29 = vpack.c.bf16 %v4766_v1, %v4723_v54  ;;  %3554 = vmatpush3.bf16.msra.mxu0 %v4016_v38  ;;  %v4018_v61 = vld [vmem:[#allocation7 + $0x1b8] sm:$0xff]   ;;  %2969 = vmatprep.mubr.msk.bf16.mxu0 %vm4816_vm5, %v4973_v16  ;;  %v3221_v54 = vpop.f32.mrb[16].mxu1 }
 0x1ce   : > { %v820_v48 = vsel %vm819_vm1, %v6097_v15, %v6096_v0  ;;  %v6098_v53 = vmov %v6097_v15  ;;  %3555 = vmatprep.subr.bf16.mxu0 %v4017_v52  ;;  %v3222_v1 = vpop.f32.mrb[17].mxu1  ;;  %v4019_v15 = vld [vmem:[#allocation7 + $0x208] sm:$0xff]  }
 0x1cf   : > { %v821_v3 = vsel %vm819_vm1, %v6099_v14, %v6098_v53  ;;  %v908_v23 = vsel %vm819_vm1, %v906_v28, %v6101_v42  ;;  %v5346_v28 = vadd.f32 %v3222_v1, %v3221_v54  ;;  %v3224_v44 = vpop.f32.mrb[18].mxu1  ;;  %v4021_v53 = vld [vmem:[#allocation7 + $0x218] sm:$0xff]   ;;  %v4022_v14 = vld [vmem:[#allocation7 + $0x220] sm:$0xff]   ;;  %v4024_v42 = vld [vmem:[#allocation7 + $0x230] sm:$0xff]  }
 0x1d0   : > { %v5271_v24 = vpack.c.bf16 %v820_v48, %v821_v3  ;;  %v5273_v17 = vpack.c.bf16 %v908_v23, %v907_v60  ;;  %v3225_v36 = vpop.f32.mrb[19].mxu1  ;;  %v6102_v48 = vld [vmem:[#allocation16_spill] sm:$0xff]  ;;  %v4023_v3 = vld [vmem:[#allocation7 + $0x228] sm:$0xff]   ;;  %v4025_v23 = vld [vmem:[#allocation7 + $0x238] sm:$0xff]  }
 0x1d1   : > { %3556 = vmatpush3.bf16.msra.mxu0 %v4018_v61  ;;  %v5351_v0 = vadd.f32 %v3225_v36, %v3224_v44  ;;  %v6106_v60 = vld [vmem:[#allocation20_spill] sm:$0xff] }
 0x1d2   : > { %2909 = vmatmul.mubr.msk.bf16.gmra.mrb[44].mxu1 %vm4816_vm5, %v4973_v16 }
 0x1d3   : > { %1591 = vmatprep.mubr.bf16.mxu1 %v4952_v5 }
 0x1d4   : > { %2972 = vmatmul.mubr.msk.bf16.gmra.mrb[40].mxu0 %vm4969_vm6, %v4975_v55 }
 0x1d5   : > { %2975 = vmatprep.mubr.msk.bf16.mxu0 %vm4816_vm5, %v4987_v47 }
 0x1da   : > { %2912 = vmatmul.mubr.msk.bf16.gmra.mrb[48].mxu1 %vm4816_vm5, %v4987_v47 }
 0x1db   : > { %1599 = vmatprep.mubr.bf16.mxu1 %v4612_v20 }
 0x1dc   : > { %2978 = vmatmul.mubr.msk.bf16.gmra.mrb[44].mxu0 %vm4969_vm6, %v5006_v25 }
 0x1dd   : > { %2981 = vmatprep.mubr.msk.bf16.mxu0 %vm4816_vm5, %v5031_v12 }
 0x1e2   : > { %2915 = vmatmul.mubr.msk.bf16.gmra.mrb[52].mxu1 %vm4816_vm5, %v5031_v12 }
 0x1e3   : > { %1607 = vmatprep.mubr.bf16.mxu1 %v4616_v21 }
 0x1e4   : > { %2984 = vmatmul.mubr.msk.bf16.gmra.mrb[48].mxu0 %vm4969_vm6, %v5033_v32 }
 0x1e5   : > { %2987 = vmatprep.mubr.msk.bf16.mxu0 %vm4816_vm5, %v5066_v50 }
 0x1ea   : > { %2918 = vmatmul.mubr.msk.bf16.gmra.mrb[56].mxu1 %vm4816_vm5, %v5066_v50 }
 0x1eb   : > { %1615 = vmatprep.mubr.bf16.mxu1 %v5052_v7 }
 0x1ec   : > { %2990 = vmatmul.mubr.msk.bf16.gmra.mrb[52].mxu0 %vm4969_vm6, %v5068_v45 }
 0x1ed   : > { %2993 = vmatprep.mubr.msk.bf16.mxu0 %vm4816_vm5, %v5082_v57 }
 0x1f2   : > { %2921 = vmatmul.mubr.msk.bf16.gmra.mrb[60].mxu1 %vm4816_vm5, %v5082_v57 }
 0x1f3   : > { %1623 = vmatprep.mubr.bf16.mxu1 %v5086_v58 }
 0x1f4   : > { %2996 = vmatmul.mubr.msk.bf16.gmra.mrb[56].mxu0 %vm4969_vm6, %v5100_v27 }
 0x1f5   : > { %2999 = vmatprep.mubr.msk.bf16.mxu0 %vm4816_vm5, %v5118_v13 }
 0x1fa   : > { %2924 = vmatmul.mubr.msk.bf16.gmra.mrb[64].mxu1 %vm4816_vm5, %v5118_v13 }
 0x1fb   : > { %1631 = vmatprep.mubr.bf16.mxu1 %v5116_v63 }
 0x1fc   : > { %3002 = vmatmul.mubr.msk.bf16.gmra.mrb[60].mxu0 %vm4969_vm6, %v5138_v51 }
 0x1fd   : > { %3005 = vmatprep.mubr.msk.bf16.mxu0 %vm4816_vm5, %v5159_v2 }
 0x202   : > { %2927 = vmatmul.mubr.msk.bf16.gmra.mrb[68].mxu1 %vm4816_vm5, %v5159_v2 }
 0x203   : > { %1639 = vmatprep.mubr.bf16.mxu1 %v5148_v34 }
 0x204   : > { %3008 = vmatmul.mubr.msk.bf16.gmra.mrb[64].mxu0 %vm4969_vm6, %v5184_v46 }
 0x205   : > { %3011 = vmatprep.mubr.msk.bf16.mxu0 %vm4816_vm5, %v5186_v6 }
 0x20a   : > { %2930 = vmatmul.mubr.msk.bf16.gmra.mrb[72].mxu1 %vm4816_vm5, %v5186_v6 }
 0x20b   : > { %1647 = vmatprep.mubr.bf16.mxu1 %v5190_v35 }
 0x20c   : > { %3014 = vmatmul.mubr.msk.bf16.gmra.mrb[68].mxu0 %vm4969_vm6, %v5219_v9 }
 0x20d   : > { %3017 = vmatprep.mubr.msk.bf16.mxu0 %vm4816_vm5, %v5221_v18 }
 0x212   : > { %2933 = vmatmul.mubr.msk.bf16.gmra.mrb[76].mxu1 %vm4816_vm5, %v5221_v18 }
 0x213   : > { %3029 = vmatprep.mubr.msk.bf16.mxu1 %vm4969_vm6, %v4790_v33  ;;  %v4020_v33 = vld [vmem:[#allocation7 + $0x210] sm:$0xff]  }
 0x214   : > { %3020 = vmatmul.mubr.msk.bf16.gmra.mrb[72].mxu0 %vm4969_vm6, %v5235_v22 }
 0x215   : > { %3023 = vmatprep.mubr.msk.bf16.mxu0 %vm4816_vm5, %v5255_v43 }
 0x21a   : > { %1850 = vmatmul.mubr.bf16.vlgmr.msra.gmra.mrb[80].mxu1 %v4654_v62  ;;  %v6104_v62 = vld [vmem:[#allocation18_spill] sm:$0xff] }
 0x21b   : > { %3750 = vmatpush3.bf16.msra.mxu1 %v4728_v19  ;;  %3032 = vmatprep.mubr.msk.bf16.mxu1 %vm4969_vm6, %v4838_v49  ;;  %v6103_v19 = vld [vmem:[#allocation17_spill] sm:$0xff] }
 0x21c   : > { %3026 = vmatmul.mubr.msk.bf16.gmra.mrb[76].mxu0 %vm4969_vm6, %v5271_v24  ;;  %3751 = vmatprep.subr.bf16.mxu1 %v4019_v15 }
 0x21d   : > { %2010 = vmatprep.mubr.bf16.mxu0 %v6102_v48 }
 0x21f   : > { %3752 = vmatpush3.bf16.msra.mxu1 %v4019_v15 }
 0x220   : > { %3753 = vmatprep.subr.bf16.mxu1 %v4020_v33 }
 0x222   : > { %1858 = vmatmul.mubr.bf16.gmra.mrb[84].mxu1 %v6102_v48 }
 0x223   : > { %3035 = vmatprep.mubr.msk.bf16.mxu1 %vm4969_vm6, %v4869_v10  ;;  %3754 = vmatpush3.bf16.msra.mxu1 %v4020_v33 }
 0x224   : > { %3077 = vmatmul.mubr.msk.bf16.vlgmr.msra.gmra.mrb[80].mxu0 %vm4816_vm5, %v6103_v19  ;;  %3755 = vmatprep.subr.bf16.mxu1 %v4021_v53 }
 0x225   : > { %2018 = vmatprep.mubr.bf16.mxu0 %v6104_v62 }
 0x227   : > { %3756 = vmatpush3.bf16.msra.mxu1 %v4021_v53 }
 0x228   : > { %3757 = vmatprep.subr.bf16.mxu1 %v4022_v14 }
 0x22a   : > { %1866 = vmatmul.mubr.bf16.gmra.mrb[88].mxu1 %v6104_v62 }
 0x22b   : > { %3038 = vmatprep.mubr.msk.bf16.mxu1 %vm4969_vm6, %v4913_v11  ;;  %3758 = vmatpush3.bf16.msra.mxu1 %v4022_v14 }
 0x22c   : > { %3080 = vmatmul.mubr.msk.bf16.gmra.mrb[84].mxu0 %vm4816_vm5, %v6105_v40  ;;  %3759 = vmatprep.subr.bf16.mxu1 %v4023_v3 }
 0x22d   : > { %2026 = vmatprep.mubr.bf16.mxu0 %v6106_v60 }
 0x22f   : > { %3760 = vmatpush3.bf16.msra.mxu1 %v4023_v3 }
 0x230   : > { %3761 = vmatprep.subr.bf16.mxu1 %v4024_v42 }
 0x232   : > { %1874 = vmatmul.mubr.bf16.gmra.mrb[92].mxu1 %v6106_v60 }
 0x233   : > { %3041 = vmatprep.mubr.msk.bf16.mxu1 %vm4969_vm6, %v4935_v37  ;;  %3762 = vmatpush3.bf16.msra.mxu1 %v4024_v42 }
 0x234   : > { %3083 = vmatmul.mubr.msk.bf16.gmra.mrb[88].mxu0 %vm4816_vm5, %v4847_v41  ;;  %3763 = vmatprep.subr.bf16.mxu1 %v4025_v23 }
 0x235   : > { %2034 = vmatprep.mubr.bf16.mxu0 %v4863_v39 }
 0x237   : > { %3764 = vmatpush3.bf16.msra.mxu1 %v4025_v23 }
 0x23a   : > { %1882 = vmatmul.mubr.bf16.gmra.mrb[96].mxu1 %v4863_v39 }
 0x23b   : > { %3044 = vmatprep.mubr.msk.bf16.mxu1 %vm4969_vm6, %v4975_v55 }
 0x23c   : > { %3086 = vmatmul.mubr.msk.bf16.gmra.mrb[92].mxu0 %vm4816_vm5, %v4886_v4 }
 0x23d   : > { %2042 = vmatprep.mubr.bf16.mxu0 %v4890_v56 }
 0x242   : > { %1890 = vmatmul.mubr.bf16.gmra.mrb[100].mxu1 %v4890_v56 }
 0x243   : > { %3047 = vmatprep.mubr.msk.bf16.mxu1 %vm4969_vm6, %v5006_v25 }
 0x244   : > { %3089 = vmatmul.mubr.msk.bf16.gmra.mrb[96].mxu0 %vm4816_vm5, %v4933_v30 }
 0x245   : > { %2050 = vmatprep.mubr.bf16.mxu0 %v4938_v26 }
 0x24a   : > { %1898 = vmatmul.mubr.bf16.gmra.mrb[104].mxu1 %v4938_v26 }
 0x24b   : > { %3050 = vmatprep.mubr.msk.bf16.mxu1 %vm4969_vm6, %v5033_v32 }
 0x24c   : > { %3092 = vmatmul.mubr.msk.bf16.gmra.mrb[100].mxu0 %vm4816_vm5, %v4973_v16 }
 0x24d   : > { %2058 = vmatprep.mubr.bf16.mxu0 %v4952_v5 }
 0x252   : > { %1906 = vmatmul.mubr.bf16.gmra.mrb[108].mxu1 %v4952_v5 }
 0x253   : > { %3053 = vmatprep.mubr.msk.bf16.mxu1 %vm4969_vm6, %v5068_v45 }
 0x254   : > { %3095 = vmatmul.mubr.msk.bf16.gmra.mrb[104].mxu0 %vm4816_vm5, %v4987_v47 }
 0x255   : > { %2066 = vmatprep.mubr.bf16.mxu0 %v4612_v20 }
 0x25a   : > { %1914 = vmatmul.mubr.bf16.gmra.mrb[112].mxu1 %v4612_v20  ;;  %v5505_v20 = vld [vmem:[%s5969_s4] ss:$0 sm:$0xff] }
 0x25b   : > { %3056 = vmatprep.mubr.msk.bf16.mxu1 %vm4969_vm6, %v5100_v27  ;;  %v1530_v26 = vadd.f32 %v5346_v28, %v5505_v20 }
 0x25c   : > { %3098 = vmatmul.mubr.msk.bf16.gmra.mrb[108].mxu0 %vm4816_vm5, %v5031_v12 }
 0x25d   : > { %2074 = vmatprep.mubr.bf16.mxu0 %v4616_v21 }
 0x262   : > { %1922 = vmatmul.mubr.bf16.gmra.mrb[116].mxu1 %v4616_v21 }
 0x263   : > { %3059 = vmatprep.mubr.msk.bf16.mxu1 %vm4969_vm6, %v5138_v51 }
 0x264   : > { %3101 = vmatmul.mubr.msk.bf16.gmra.mrb[112].mxu0 %vm4816_vm5, %v5066_v50  ;;  %v4026_v50 = vld [vmem:[#allocation8] sm:$0xff]  }
 0x265   : > { %2082 = vmatprep.mubr.bf16.mxu0 %v5052_v7  ;;  %3797 = vmatprep.subr.bf16.mxu0 %v4026_v50 }
 0x266   : > { %3798 = vmatpush3.bf16.msra.mxu0 %v4026_v50 }
 0x26a   : > { %1930 = vmatmul.mubr.bf16.gmra.mrb[120].mxu1 %v5052_v7 }
 0x26b   : > { %3062 = vmatprep.mubr.msk.bf16.mxu1 %vm4969_vm6, %v5184_v46 }
 0x26c   : > { %3104 = vmatmul.mubr.msk.bf16.gmra.mrb[116].mxu0 %vm4816_vm5, %v5082_v57  ;;  %v1533_v57 = vadd.f32 %v5351_v0, %v5505_v20 }
 0x26d   : > { %2090 = vmatprep.mubr.bf16.mxu0 %v5086_v58 }
 0x272   : > { %1938 = vmatmul.mubr.bf16.gmra.mrb[124].mxu1 %v5086_v58 }
 0x273   : > { %3065 = vmatprep.mubr.msk.bf16.mxu1 %vm4969_vm6, %v5219_v9 }
 0x274   : > { %3107 = vmatmul.mubr.msk.bf16.gmra.mrb[120].mxu0 %vm4816_vm5, %v5118_v13 }
 0x275   : > { %2098 = vmatprep.mubr.bf16.mxu0 %v5116_v63  ;;  %v3227_v21 = vpop.f32.mrb[20].mxu1 }
 0x276   : > { %v3228_v41 = vpop.f32.mrb[21].mxu1  ;;  %v3333_v39 = vpop.f32.mrb[16].mxu0 }
 0x277   : > { %v3229_v4 = vadd.f32 %v3228_v41, %v3227_v21  ;;  %v3230_v56 = vpop.f32.mrb[22].mxu1  ;;  %v3334_v30 = vpop.f32.mrb[17].mxu0 }
 0x278   : > { %v3335_v5 = vadd.f32 %v3334_v30, %v3333_v39  ;;  %v3231_v16 = vpop.f32.mrb[23].mxu1  ;;  %v3336_v47 = vpop.f32.mrb[18].mxu0 }
 0x279   : > { %v3232_v12 = vadd.f32 %v3231_v16, %v3230_v56  ;;  %v3337_v7 = vpop.f32.mrb[19].mxu0  ;;  %v1538_v28 = vadd.f32 %v3229_v4, %v5505_v20  ;;  %v4027_v56 = vld [vmem:[#allocation8 + $0x8] sm:$0xff]  }
 0x27a   : > { %v5511_v58 = vadd.f32 %v3335_v5, %v1530_v26  ;;  %v3338_v13 = vadd.f32 %v3337_v7, %v3336_v47  ;;  %1946 = vmatmul.mubr.bf16.gmra.mrb[128].mxu1 %v5116_v63  ;;  %3799 = vmatprep.subr.bf16.mxu0 %v4027_v56 }
 0x27b   : > { %3068 = vmatprep.mubr.msk.bf16.mxu1 %vm4969_vm6, %v5235_v22  ;;  %3800 = vmatpush3.bf16.msra.mxu0 %v4027_v56 }
 0x27c   : > { %3110 = vmatmul.mubr.msk.bf16.gmra.mrb[124].mxu0 %vm4816_vm5, %v5159_v2  ;;  %v5520_v59 = vadd.f32 %v3338_v13, %v1533_v57  ;;  %v1541_v2 = vadd.f32 %v3232_v12, %v5505_v20 }
 0x27d   : > { %2106 = vmatprep.mubr.bf16.mxu0 %v5148_v34  ;;  %v3233_v38 = vpop.f32.mrb[24].mxu1 }
 0x27e   : > { %v3234_v52 = vpop.f32.mrb[25].mxu1  ;;  %v3339_v61 = vpop.f32.mrb[20].mxu0 }
 0x27f   : > { %v3235_v54 = vadd.f32 %v3234_v52, %v3233_v38  ;;  %v3236_v1 = vpop.f32.mrb[26].mxu1  ;;  %v3340_v63 = vpop.f32.mrb[21].mxu0 }
 0x280   : > { %v3341_v44 = vadd.f32 %v3340_v63, %v3339_v61  ;;  %v3237_v36 = vpop.f32.mrb[27].mxu1  ;;  %v3342_v0 = vpop.f32.mrb[22].mxu0 }
 0x281   : > { %v3238_v15 = vadd.f32 %v3237_v36, %v3236_v1  ;;  %v3343_v48 = vpop.f32.mrb[23].mxu0 }
 0x282   : > { %v5525_v33 = vadd.f32 %v3341_v44, %v1538_v28  ;;  %v3344_v53 = vadd.f32 %v3343_v48, %v3342_v0  ;;  %1954 = vmatmul.mubr.bf16.gmra.mrb[132].mxu1 %v5148_v34  ;;  %v1546_v34 = vadd.f32 %v3235_v54, %v5505_v20  ;;  %v6107_v44 = vmov 0.0|0.0  }
 0x283   : > { %3071 = vmatprep.mubr.msk.bf16.mxu1 %vm4969_vm6, %v5271_v24 }
 0x284   : > { %3113 = vmatmul.mubr.msk.bf16.gmra.mrb[128].mxu0 %vm4816_vm5, %v5186_v6  ;;  %v5534_v19 = vadd.f32 %v3344_v53, %v1541_v2  ;;  %v1549_v6 = vadd.f32 %v3238_v15, %v5505_v20 }
 0x285   : > { %2114 = vmatprep.mubr.bf16.mxu0 %v5190_v35  ;;  %v3239_v62 = vpop.f32.mrb[28].mxu1 }
 0x286   : > { %v3240_v14 = vpop.f32.mrb[29].mxu1 }
 0x287   : > { %v3345_v3 = vpop.f32.mrb[24].mxu0  ;;  %v3241_v40 = vadd.f32 %v3240_v14, %v3239_v62  ;;  %v3242_v60 = vpop.f32.mrb[30].mxu1 }
 0x288   : > { %v3346_v42 = vpop.f32.mrb[25].mxu0  ;;  %v3243_v21 = vpop.f32.mrb[31].mxu1 }
 0x289   : > { %v3347_v23 = vadd.f32 %v3346_v42, %v3345_v3  ;;  %v3348_v41 = vpop.f32.mrb[26].mxu0  ;;  %v3244_v39 = vadd.f32 %v3243_v21, %v3242_v60  ;;  %v1554_v57 = vadd.f32 %v3241_v40, %v5505_v20  ;;  %v4028_v40 = vld [vmem:[#allocation8 + $0x10] sm:$0xff]  }
 0x28a   : > { %v3349_v4 = vpop.f32.mrb[27].mxu0  ;;  %1962 = vmatmul.mubr.bf16.gmra.mrb[136].mxu1 %v5190_v35  ;;  %3801 = vmatprep.subr.bf16.mxu0 %v4028_v40 }
 0x28b   : > { %v5539_v30 = vadd.f32 %v3347_v23, %v1546_v34  ;;  %v3350_v26 = vadd.f32 %v3349_v4, %v3348_v41  ;;  %3074 = vmatprep.mubr.msk.bf16.mxu1 %vm4969_vm6, %v5273_v17  ;;  %3802 = vmatpush3.bf16.msra.mxu0 %v4028_v40 }
 0x28c   : > { %3116 = vmatmul.mubr.msk.bf16.gmra.mrb[132].mxu0 %vm4816_vm5, %v5221_v18  ;;  %v1557_v18 = vadd.f32 %v3244_v39, %v5505_v20 }
 0x28d   : > { %v5548_v5 = vadd.f32 %v3350_v26, %v1549_v6  ;;  %2122 = vmatprep.mubr.bf16.mxu0 %v5277_v29  ;;  %v3245_v16 = vpop.f32.mrb[32].mxu1 }
 0x28e   : > { %v3246_v47 = vpop.f32.mrb[33].mxu1 }
 0x28f   : > { %v3351_v12 = vpop.f32.mrb[28].mxu0  ;;  %v3247_v7 = vadd.f32 %v3246_v47, %v3245_v16  ;;  %v3248_v50 = vpop.f32.mrb[34].mxu1 }
 0x290   : > { %v3352_v35 = vpop.f32.mrb[29].mxu0  ;;  %v3249_v38 = vpop.f32.mrb[35].mxu1 }
 0x291   : > { %v3353_v13 = vadd.f32 %v3352_v35, %v3351_v12  ;;  %v3354_v52 = vpop.f32.mrb[30].mxu0  ;;  %v3250_v61 = vadd.f32 %v3249_v38, %v3248_v50 }
 0x292   : > { %v3355_v54 = vpop.f32.mrb[31].mxu0  ;;  %1970 = vmatmul.mubr.bf16.gmra.mrb[140].mxu1 %v5277_v29  ;;  %v1562_v29 = vadd.f32 %v3247_v7, %v5505_v20 }
 0x293   : > { %v5553_v1 = vadd.f32 %v3353_v13, %v1554_v57  ;;  %v3356_v63 = vadd.f32 %v3355_v54, %v3354_v52  ;;  %3765 = vmatprep.mubr.msk.bf16.mxu1 %vm4969_vm6, %v4838_v49  ;;  %v1565_v49 = vadd.f32 %v3250_v61, %v5505_v20 }
 0x294   : > { %3119 = vmatmul.mubr.msk.bf16.gmra.mrb[136].mxu0 %vm4816_vm5, %v5255_v43 }
 0x295   : > { %v5562_v28 = vadd.f32 %v3356_v63, %v1557_v18  ;;  %2130 = vmatprep.mubr.bf16.mxu0 %v6107_v44  ;;  %v3251_v36 = vpop.f32.mrb[36].mxu1 }
 0x296   : > { %v3252_v0 = vpop.f32.mrb[37].mxu1 }
 0x297   : > { %v3357_v15 = vpop.f32.mrb[32].mxu0  ;;  %v3253_v48 = vadd.f32 %v3252_v0, %v3251_v36  ;;  %v3254_v2 = vpop.f32.mrb[38].mxu1 }
 0x298   : > { %v3358_v53 = vpop.f32.mrb[33].mxu0  ;;  %v3255_v14 = vpop.f32.mrb[39].mxu1 }
 0x299   : > { %v3359_v62 = vadd.f32 %v3358_v53, %v3357_v15  ;;  %v3360_v31 = vpop.f32.mrb[34].mxu0  ;;  %v3256_v43 = vadd.f32 %v3255_v14, %v3254_v2  ;;  %v1570_v6 = vadd.f32 %v3253_v48, %v5505_v20 }
 0x29a   : > { %v3361_v3 = vpop.f32.mrb[35].mxu0  ;;  %3766 = vmatmul.mubr.msk.bf16.vlgmr.msra.gmra.mrb[144].mxu1 %vm4969_vm6, %v4869_v10 }
 0x29b   : > { %v5567_v60 = vadd.f32 %v3359_v62, %v1562_v29  ;;  %v3362_v42 = vadd.f32 %v3361_v3, %v3360_v31  ;;  %3769 = vmatprep.mubr.msk.bf16.mxu1 %vm4969_vm6, %v4913_v11  ;;  %v1573_v7 = vadd.f32 %v3256_v43, %v5505_v20 }
 0x29c   : > { %2131 = vmatmul.mubr.bf16.gmra.mrb[140].mxu0 %v6107_v44 }
 0x29d   : > { %v5576_v34 = vadd.f32 %v3362_v42, %v1565_v49  ;;  %v3257_v23 = vpop.f32.mrb[40].mxu1 }
 0x29e   : > { %v3258_v21 = vpop.f32.mrb[41].mxu1 }
 0x29f   : > { %v3363_v41 = vpop.f32.mrb[36].mxu0  ;;  %v3259_v39 = vadd.f32 %v3258_v21, %v3257_v23  ;;  %v3260_v4 = vpop.f32.mrb[42].mxu1 }
 0x2a0   : > { %v3364_v56 = vpop.f32.mrb[37].mxu0  ;;  %v3261_v10 = vpop.f32.mrb[43].mxu1 }
 0x2a1   : > { %v3365_v26 = vadd.f32 %v3364_v56, %v3363_v41  ;;  %v3366_v16 = vpop.f32.mrb[38].mxu0  ;;  %v3262_v47 = vadd.f32 %v3261_v10, %v3260_v4  ;;  %v1578_v18 = vadd.f32 %v3259_v39, %v5505_v20 }
 0x2a2   : > { %v3367_v12 = vpop.f32.mrb[39].mxu0  ;;  %3770 = vmatmul.mubr.msk.bf16.gmra.mrb[148].mxu1 %vm4969_vm6, %v4935_v37  ;;  %v4029_v37 = vld [vmem:[#allocation8 + $0x18] sm:$0xff]  }
 0x2a3   : > { %v5580_v11 = vadd.f32 %v3365_v26, %v1570_v6  ;;  %v3368_v50 = vadd.f32 %v3367_v12, %v3366_v16  ;;  %3773 = vmatprep.mubr.msk.bf16.mxu1 %vm4969_vm6, %v4975_v55  ;;  %v1581_v2 = vadd.f32 %v3262_v47, %v5505_v20  ;;  %3803 = vmatprep.subr.bf16.mxu0 %v4029_v37 }
 0x2a4   : > { %3804 = vmatpush3.bf16.msra.mxu0 %v4029_v37 }
 0x2a5   : > { %v5588_v35 = vadd.f32 %v3368_v50, %v1573_v7  ;;  %v3263_v57 = vpop.f32.mrb[44].mxu1 }
 0x2a6   : > { %v3264_v13 = vpop.f32.mrb[45].mxu1 }
 0x2a7   : > { %v3369_v38 = vpop.f32.mrb[40].mxu0  ;;  %v3265_v52 = vadd.f32 %v3264_v13, %v3263_v57  ;;  %v3266_v61 = vpop.f32.mrb[46].mxu1 }
 0x2a8   : > { %v3370_v54 = vpop.f32.mrb[41].mxu0  ;;  %v3267_v36 = vpop.f32.mrb[47].mxu1 }
 0x2a9   : > { %v3371_v63 = vadd.f32 %v3370_v54, %v3369_v38  ;;  %v3372_v0 = vpop.f32.mrb[42].mxu0  ;;  %v3268_v15 = vadd.f32 %v3267_v36, %v3266_v61  ;;  %v1586_v49 = vadd.f32 %v3265_v52, %v5505_v20 }
 0x2aa   : > { %v3373_v48 = vpop.f32.mrb[43].mxu0  ;;  %3774 = vmatmul.mubr.msk.bf16.gmra.mrb[152].mxu1 %vm4969_vm6, %v5006_v25 }
 0x2ab   : > { %v5592_v53 = vadd.f32 %v3371_v63, %v1578_v18  ;;  %v3374_v55 = vadd.f32 %v3373_v48, %v3372_v0  ;;  %3777 = vmatprep.mubr.msk.bf16.mxu1 %vm4969_vm6, %v5033_v32  ;;  %v1589_v39 = vadd.f32 %v3268_v15, %v5505_v20 }
 0x2ad   : > { %v5600_v29 = vadd.f32 %v3374_v55, %v1581_v2  ;;  %v3269_v62 = vpop.f32.mrb[48].mxu1 }
 0x2ae   : > { %v3270_v14 = vpop.f32.mrb[49].mxu1 }
 0x2af   : > { %v3375_v31 = vpop.f32.mrb[44].mxu0  ;;  %v3271_v43 = vadd.f32 %v3270_v14, %v3269_v62  ;;  %v3272_v3 = vpop.f32.mrb[50].mxu1 }
 0x2b0   : > { %v3376_v40 = vpop.f32.mrb[45].mxu0  ;;  %v3273_v23 = vpop.f32.mrb[51].mxu1 }
 0x2b1   : > { %v3377_v42 = vadd.f32 %v3376_v40, %v3375_v31  ;;  %v3378_v21 = vpop.f32.mrb[46].mxu0  ;;  %v3274_v25 = vadd.f32 %v3273_v23, %v3272_v3  ;;  %v1594_v7 = vadd.f32 %v3271_v43, %v5505_v20 }
 0x2b2   : > { %v3379_v41 = vpop.f32.mrb[47].mxu0  ;;  %3778 = vmatmul.mubr.msk.bf16.gmra.mrb[156].mxu1 %vm4969_vm6, %v5068_v45  ;;  %v4030_v45 = vld [vmem:[#allocation8 + $0x20] sm:$0xff]  }
 0x2b3   : > { %v5604_v32 = vadd.f32 %v3377_v42, %v1586_v49  ;;  %v3380_v4 = vadd.f32 %v3379_v41, %v3378_v21  ;;  %3781 = vmatprep.mubr.msk.bf16.mxu1 %vm4969_vm6, %v5100_v27  ;;  %v1597_v61 = vadd.f32 %v3274_v25, %v5505_v20  ;;  %3805 = vmatprep.subr.bf16.mxu0 %v4030_v45 }
 0x2b4   : > { %3806 = vmatpush3.bf16.msra.mxu0 %v4030_v45 }
 0x2b5   : > { %v5612_v56 = vadd.f32 %v3380_v4, %v1589_v39  ;;  %v3275_v6 = vpop.f32.mrb[52].mxu1 }
 0x2b6   : > { %v3276_v26 = vpop.f32.mrb[53].mxu1 }
 0x2b7   : > { %v3381_v10 = vpop.f32.mrb[48].mxu0  ;;  %v3277_v16 = vadd.f32 %v3276_v26, %v3275_v6  ;;  %v3278_v47 = vpop.f32.mrb[54].mxu1 }
 0x2b8   : > { %v3382_v12 = vpop.f32.mrb[49].mxu0  ;;  %v3279_v57 = vpop.f32.mrb[55].mxu1 }
 0x2b9   : > { %v3383_v50 = vadd.f32 %v3382_v12, %v3381_v10  ;;  %v3384_v13 = vpop.f32.mrb[50].mxu0  ;;  %v3280_v38 = vadd.f32 %v3279_v57, %v3278_v47  ;;  %v1602_v2 = vadd.f32 %v3277_v16, %v5505_v20 }
 0x2ba   : > { %v3385_v52 = vpop.f32.mrb[51].mxu0  ;;  %3782 = vmatmul.mubr.msk.bf16.gmra.mrb[160].mxu1 %vm4969_vm6, %v5138_v51 }
 0x2bb   : > { %v5616_v54 = vadd.f32 %v3383_v50, %v1594_v7  ;;  %v3386_v27 = vadd.f32 %v3385_v52, %v3384_v13  ;;  %3785 = vmatprep.mubr.msk.bf16.mxu1 %vm4969_vm6, %v5184_v46  ;;  %v1605_v43 = vadd.f32 %v3280_v38, %v5505_v20 }
 0x2bd   : > { %v5624_v18 = vadd.f32 %v3386_v27, %v1597_v61  ;;  %v3281_v63 = vpop.f32.mrb[56].mxu1 }
 0x2be   : > { %v3282_v36 = vpop.f32.mrb[57].mxu1 }
 0x2bf   : > { %v3387_v0 = vpop.f32.mrb[52].mxu0  ;;  %v3283_v15 = vadd.f32 %v3282_v36, %v3281_v63  ;;  %v3284_v48 = vpop.f32.mrb[58].mxu1 }
 0x2c0   : > { %v3388_v37 = vpop.f32.mrb[53].mxu0  ;;  %v3285_v62 = vpop.f32.mrb[59].mxu1 }
 0x2c1   : > { %v3389_v55 = vadd.f32 %v3388_v37, %v3387_v0  ;;  %v3390_v14 = vpop.f32.mrb[54].mxu0  ;;  %v3286_v51 = vadd.f32 %v3285_v62, %v3284_v48  ;;  %v1610_v39 = vadd.f32 %v3283_v15, %v5505_v20 }
 0x2c2   : > { %v3391_v31 = vpop.f32.mrb[55].mxu0  ;;  %3786 = vmatmul.mubr.msk.bf16.gmra.mrb[164].mxu1 %vm4969_vm6, %v5219_v9  ;;  %v4031_v9 = vld [vmem:[#allocation8 + $0x28] sm:$0xff]  }
 0x2c3   : > { %v5628_v46 = vadd.f32 %v3389_v55, %v1602_v2  ;;  %v3392_v3 = vadd.f32 %v3391_v31, %v3390_v14  ;;  %3789 = vmatprep.mubr.msk.bf16.mxu1 %vm4969_vm6, %v5235_v22  ;;  %v1613_v47 = vadd.f32 %v3286_v51, %v5505_v20  ;;  %3807 = vmatprep.subr.bf16.mxu0 %v4031_v9 }
 0x2c4   : > { %3808 = vmatpush3.bf16.msra.mxu0 %v4031_v9 }
 0x2c5   : > { %v5636_v40 = vadd.f32 %v3392_v3, %v1605_v43  ;;  %v3287_v49 = vpop.f32.mrb[60].mxu1 }
 0x2c6   : > { %v3288_v42 = vpop.f32.mrb[61].mxu1 }
 0x2c7   : > { %v3393_v23 = vpop.f32.mrb[56].mxu0  ;;  %v3289_v21 = vadd.f32 %v3288_v42, %v3287_v49  ;;  %v3290_v25 = vpop.f32.mrb[62].mxu1 }
 0x2c8   : > { %v3394_v41 = vpop.f32.mrb[57].mxu0  ;;  %v3291_v6 = vpop.f32.mrb[63].mxu1 }
 0x2c9   : > { %v3395_v4 = vadd.f32 %v3394_v41, %v3393_v23  ;;  %v3396_v26 = vpop.f32.mrb[58].mxu0  ;;  %v3292_v10 = vadd.f32 %v3291_v6, %v3290_v25  ;;  %v1618_v61 = vadd.f32 %v3289_v21, %v5505_v20  ;;  %v4032_v21 = vld [vmem:[#allocation8 + $0x30] sm:$0xff]  }
 0x2ca   : > { %v3397_v16 = vpop.f32.mrb[59].mxu0  ;;  %3790 = vmatmul.mubr.msk.bf16.gmra.mrb[168].mxu1 %vm4969_vm6, %v5271_v24  ;;  %3809 = vmatprep.subr.bf16.mxu0 %v4032_v21 }
 0x2cb   : > { %v5640_v12 = vadd.f32 %v3395_v4, %v1610_v39  ;;  %v3398_v22 = vadd.f32 %v3397_v16, %v3396_v26  ;;  %3793 = vmatprep.mubr.msk.bf16.mxu1 %vm4969_vm6, %v5273_v17  ;;  %v1621_v8 = vadd.f32 %v3292_v10, %v5505_v20  ;;  %3810 = vmatpush3.bf16.msra.mxu0 %v4032_v21 }
 0x2cd   : > { %v5648_v7 = vadd.f32 %v3398_v22, %v1613_v47  ;;  %v3293_v50 = vpop.f32.mrb[64].mxu1 }
 0x2ce   : > { %v3294_v57 = vpop.f32.mrb[65].mxu1 }
 0x2cf   : > { %v3399_v13 = vpop.f32.mrb[60].mxu0  ;;  %v3295_v38 = vadd.f32 %v3294_v57, %v3293_v50  ;;  %v3296_v52 = vpop.f32.mrb[66].mxu1 }
 0x2d0   : > { %v3400_v45 = vpop.f32.mrb[61].mxu0  ;;  %v3297_v63 = vpop.f32.mrb[67].mxu1 }
 0x2d1   : > { %v3401_v27 = vadd.f32 %v3400_v45, %v3399_v13  ;;  %v3402_v36 = vpop.f32.mrb[62].mxu0  ;;  %v3298_v24 = vadd.f32 %v3297_v63, %v3296_v52  ;;  %v1626_v31 = vadd.f32 %v3295_v38, %v5505_v20 }
 0x2d2   : > { %v3403_v0 = vpop.f32.mrb[63].mxu0  ;;  %3794 = vmatmul.mubr.bf16.gmra.mrb[172].mxu1 %v6107_v44 }
 0x2d3   : > { %v5652_v17 = vadd.f32 %v3401_v27, %v1618_v61  ;;  %v3404_v15 = vadd.f32 %v3403_v0, %v3402_v36  ;;  %v1629_v25 = vadd.f32 %v3298_v24, %v5505_v20 }
 0x2d5   : > { %v5655_v48 = vadd.f32 %v3404_v15, %v1621_v8  ;;  %v3299_v37 = vpop.f32.mrb[68].mxu1 }
 0x2d6   : > { %v3300_v2 = vpop.f32.mrb[69].mxu1 }
 0x2d7   : > { %v3405_v55 = vpop.f32.mrb[64].mxu0  ;;  %v3301_v62 = vadd.f32 %v3300_v2, %v3299_v37  ;;  %v3302_v14 = vpop.f32.mrb[70].mxu1 }
 0x2d8   : > { %v3406_v51 = vpop.f32.mrb[65].mxu0  ;;  %v3303_v3 = vpop.f32.mrb[71].mxu1 }
 0x2d9   : > { %v3407_v43 = vadd.f32 %v3406_v51, %v3405_v55  ;;  %v3408_v49 = vpop.f32.mrb[66].mxu0  ;;  %v3304_v42 = vadd.f32 %v3303_v3, %v3302_v14  ;;  %v1634_v47 = vadd.f32 %v3301_v62, %v5505_v20 }
 0x2da   : > { %v3409_v23 = vpop.f32.mrb[67].mxu0 }
 0x2db   : > { %v5659_v41 = vadd.f32 %v3407_v43, %v1626_v31  ;;  %v3410_v44 = vadd.f32 %v3409_v23, %v3408_v49  ;;  %v1637_v52 = vadd.f32 %v3304_v42, %v5505_v20  ;;  %v4033_v31 = vld [vmem:[#allocation8 + $0x38] sm:$0xff]  }
 0x2dc   : > { %3811 = vmatprep.subr.bf16.mxu0 %v4033_v31 }
 0x2dd   : > { %v5661_v39 = vadd.f32 %v3410_v44, %v1629_v25  ;;  %v3305_v4 = vpop.f32.mrb[72].mxu1  ;;  %3812 = vmatpush3.bf16.msra.mxu0 %v4033_v31 }
 0x2de   : > { %v3306_v6 = vpop.f32.mrb[73].mxu1 }
 0x2df   : > { %v3411_v26 = vpop.f32.mrb[68].mxu0  ;;  %v3307_v10 = vadd.f32 %v3306_v6, %v3305_v4  ;;  %v3308_v16 = vpop.f32.mrb[74].mxu1 }
 0x2e0   : > { %v3412_v9 = vpop.f32.mrb[69].mxu0  ;;  %v3309_v50 = vpop.f32.mrb[75].mxu1 }
 0x2e1   : > { %v3413_v22 = vadd.f32 %v3412_v9, %v3411_v26  ;;  %v3414_v57 = vpop.f32.mrb[70].mxu0  ;;  %v3310_v13 = vadd.f32 %v3309_v50, %v3308_v16  ;;  %v1642_v37 = vadd.f32 %v3307_v10, %v5505_v20 }
 0x2e2   : > { %v3415_v38 = vpop.f32.mrb[71].mxu0 }
 0x2e3   : > { %v5665_v45 = vadd.f32 %v3413_v22, %v1634_v47  ;;  %v3416_v61 = vadd.f32 %v3415_v38, %v3414_v57  ;;  %v1645_v43 = vadd.f32 %v3310_v13, %v5505_v20 }
 0x2e5   : > { %v5667_v27 = vadd.f32 %v3416_v61, %v1637_v52  ;;  %v3311_v63 = vpop.f32.mrb[76].mxu1 }
 0x2e6   : > { %v3312_v36 = vpop.f32.mrb[77].mxu1 }
 0x2e7   : > { %v3417_v24 = vpop.f32.mrb[72].mxu0  ;;  %v3313_v0 = vadd.f32 %v3312_v36, %v3311_v63  ;;  %v3314_v8 = vpop.f32.mrb[78].mxu1 }
 0x2e8   : > { %v3418_v15 = vpop.f32.mrb[73].mxu0  ;;  %v3315_v55 = vpop.f32.mrb[79].mxu1 }
 0x2e9   : > { %v3419_v2 = vadd.f32 %v3418_v15, %v3417_v24  ;;  %v3420_v62 = vpop.f32.mrb[74].mxu0  ;;  %v3316_v14 = vadd.f32 %v3315_v55, %v3314_v8  ;;  %v1650_v26 = vadd.f32 %v3313_v0, %v5505_v20 }
 0x2ea   : > { %v3421_v51 = vpop.f32.mrb[75].mxu0 }
 0x2eb   : > { %v5671_v3 = vadd.f32 %v3419_v2, %v1642_v37  ;;  %v3422_v49 = vadd.f32 %v3421_v51, %v3420_v62  ;;  %v1653_v57 = vadd.f32 %v3316_v14, %v5505_v20 }
 0x2ed   : > { %v5673_v42 = vadd.f32 %v3422_v49, %v1645_v43  ;;  %v3445_v23 = vpop.f32.mrb[80].mxu1 }
 0x2ee   : > { %v3446_v25 = vpop.f32.mrb[81].mxu1 }
 0x2ef   : > { %v3423_v21 = vpop.f32.mrb[76].mxu0  ;;  %v3447_v44 = vadd.f32 %v3446_v25, %v3445_v23  ;;  %v3448_v6 = vpop.f32.mrb[82].mxu1 }
 0x2f0   : > { %v3424_v4 = vpop.f32.mrb[77].mxu0  ;;  %v3449_v9 = vpop.f32.mrb[83].mxu1 }
 0x2f1   : > { %v3425_v10 = vadd.f32 %v3424_v4, %v3423_v21  ;;  %v3426_v16 = vpop.f32.mrb[78].mxu0  ;;  %v1852_v47 = vadd.f32 %v3447_v44, %v5511_v58  ;;  %v3450_v22 = vadd.f32 %v3449_v9, %v3448_v6 }
 0x2f2   : > { %v3427_v50 = vpop.f32.mrb[79].mxu0 }
 0x2f3   : > { %v5678_v13 = vadd.f32 %v3425_v10, %v1650_v26  ;;  %v3428_v38 = vadd.f32 %v3427_v50, %v3426_v16  ;;  %v1855_v52 = vadd.f32 %v3450_v22, %v5520_v59 }
 0x2f5   : > { %v5681_v61 = vadd.f32 %v3428_v38, %v1653_v57  ;;  %v3451_v63 = vpop.f32.mrb[84].mxu1 }
 0x2f6   : > { %v3452_v36 = vpop.f32.mrb[85].mxu1 }
 0x2f7   : > { %v3557_v24 = vpop.f32.mrb[80].mxu0  ;;  %v3453_v0 = vadd.f32 %v3452_v36, %v3451_v63  ;;  %v3454_v8 = vpop.f32.mrb[86].mxu1 }
 0x2f8   : > { %v3558_v15 = vpop.f32.mrb[81].mxu0  ;;  %v3455_v2 = vpop.f32.mrb[87].mxu1 }
 0x2f9   : > { %v3559_v37 = vadd.f32 %v3558_v15, %v3557_v24  ;;  %v3560_v58 = vpop.f32.mrb[82].mxu0  ;;  %v1860_v55 = vadd.f32 %v3453_v0, %v5525_v33  ;;  %v3456_v62 = vadd.f32 %v3455_v2, %v3454_v8 }
 0x2fa   : > { %v3561_v20 = vpop.f32.mrb[83].mxu0 }
 0x2fb   : > { %v3562_v14 = vadd.f32 %v3561_v20, %v3560_v58  ;;  %v5684_v51 = vadd.f32 %v3559_v37, %v1852_v47  ;;  %v1863_v59 = vadd.f32 %v3456_v62, %v5534_v19 }
 0x2fd   : > { %v5687_v31 = vadd.f32 %v3562_v14, %v1855_v52  ;;  %v3457_v43 = vpop.f32.mrb[88].mxu1 }
 0x2fe   : > { %v3458_v49 = vpop.f32.mrb[89].mxu1 }
 0x2ff   : > { %v3563_v23 = vpop.f32.mrb[84].mxu0  ;;  %v3459_v21 = vadd.f32 %v3458_v49, %v3457_v43  ;;  %v3460_v25 = vpop.f32.mrb[90].mxu1 }
 0x300   : > { %v3564_v44 = vpop.f32.mrb[85].mxu0  ;;  %v3461_v6 = vpop.f32.mrb[91].mxu1 }
 0x301   : > { %v3565_v4 = vadd.f32 %v3564_v44, %v3563_v23  ;;  %v3566_v26 = vpop.f32.mrb[86].mxu0  ;;  %v1868_v33 = vadd.f32 %v3459_v21, %v5539_v30  ;;  %v3462_v10 = vadd.f32 %v3461_v6, %v3460_v25 }
 0x302   : > { %v3567_v16 = vpop.f32.mrb[87].mxu0 }
 0x303   : > { %v3568_v9 = vadd.f32 %v3567_v16, %v3566_v26  ;;  %v5690_v47 = vadd.f32 %v3565_v4, %v1860_v55  ;;  %v1871_v19 = vadd.f32 %v3462_v10, %v5548_v5 }
 0x305   : > { %v5693_v22 = vadd.f32 %v3568_v9, %v1863_v59  ;;  %v3463_v50 = vpop.f32.mrb[92].mxu1 }
 0x306   : > { %v3464_v57 = vpop.f32.mrb[93].mxu1 }
 0x307   : > { %v3569_v38 = vpop.f32.mrb[88].mxu0  ;;  %v3465_v52 = vadd.f32 %v3464_v57, %v3463_v50  ;;  %v3466_v63 = vpop.f32.mrb[94].mxu1 }
 0x308   : > { %v3570_v36 = vpop.f32.mrb[89].mxu0  ;;  %v3467_v0 = vpop.f32.mrb[95].mxu1 }
 0x309   : > { %v3571_v24 = vadd.f32 %v3570_v36, %v3569_v38  ;;  %v3572_v8 = vpop.f32.mrb[90].mxu0  ;;  %v1876_v30 = vadd.f32 %v3465_v52, %v5553_v1  ;;  %v3468_v15 = vadd.f32 %v3467_v0, %v3466_v63 }
 0x30a   : > { %v3573_v37 = vpop.f32.mrb[91].mxu0 }
 0x30b   : > { %v3574_v2 = vadd.f32 %v3573_v37, %v3572_v8  ;;  %v5696_v58 = vadd.f32 %v3571_v24, %v1868_v33  ;;  %v1879_v5 = vadd.f32 %v3468_v15, %v5562_v28 }
 0x30d   : > { %v5699_v55 = vadd.f32 %v3574_v2, %v1871_v19  ;;  %v3469_v62 = vpop.f32.mrb[96].mxu1 }
 0x30e   : > { %v3470_v20 = vpop.f32.mrb[97].mxu1 }
 0x30f   : > { %v3575_v14 = vpop.f32.mrb[92].mxu0  ;;  %v3471_v59 = vadd.f32 %v3470_v20, %v3469_v62  ;;  %v3472_v43 = vpop.f32.mrb[98].mxu1 }
 0x310   : > { %v3576_v49 = vpop.f32.mrb[93].mxu0  ;;  %v3473_v21 = vpop.f32.mrb[99].mxu1 }
 0x311   : > { %v3577_v23 = vadd.f32 %v3576_v49, %v3575_v14  ;;  %v3578_v25 = vpop.f32.mrb[94].mxu0  ;;  %v1884_v1 = vadd.f32 %v3471_v59, %v5567_v60  ;;  %v3474_v44 = vadd.f32 %v3473_v21, %v3472_v43 }
 0x312   : > { %v3579_v4 = vpop.f32.mrb[95].mxu0 }
 0x313   : > { %v3580_v6 = vadd.f32 %v3579_v4, %v3578_v25  ;;  %v5702_v26 = vadd.f32 %v3577_v23, %v1876_v30  ;;  %v1887_v28 = vadd.f32 %v3474_v44, %v5576_v34 }
 0x315   : > { %v5705_v33 = vadd.f32 %v3580_v6, %v1879_v5  ;;  %v3475_v10 = vpop.f32.mrb[100].mxu1 }
 0x316   : > { %v3476_v16 = vpop.f32.mrb[101].mxu1 }
 0x317   : > { %v3581_v9 = vpop.f32.mrb[96].mxu0  ;;  %v3477_v19 = vadd.f32 %v3476_v16, %v3475_v10  ;;  %v3478_v50 = vpop.f32.mrb[102].mxu1 }
 0x318   : > { %v3582_v57 = vpop.f32.mrb[97].mxu0  ;;  %v3479_v52 = vpop.f32.mrb[103].mxu1 }
 0x319   : > { %v3583_v38 = vadd.f32 %v3582_v57, %v3581_v9  ;;  %v3584_v63 = vpop.f32.mrb[98].mxu0  ;;  %v1892_v60 = vadd.f32 %v3477_v19, %v5580_v11  ;;  %v3480_v36 = vadd.f32 %v3479_v52, %v3478_v50 }
 0x31a   : > { %v3585_v24 = vpop.f32.mrb[99].mxu0 }
 0x31b   : > { %v3586_v0 = vadd.f32 %v3585_v24, %v3584_v63  ;;  %v5708_v8 = vadd.f32 %v3583_v38, %v1884_v1  ;;  %v1895_v34 = vadd.f32 %v3480_v36, %v5588_v35 }
 0x31d   : > { %v5711_v30 = vadd.f32 %v3586_v0, %v1887_v28  ;;  %v3481_v15 = vpop.f32.mrb[104].mxu1 }
 0x31e   : > { %v3482_v37 = vpop.f32.mrb[105].mxu1 }
 0x31f   : > { %v3587_v2 = vpop.f32.mrb[100].mxu0  ;;  %v3483_v5 = vadd.f32 %v3482_v37, %v3481_v15  ;;  %v3484_v62 = vpop.f32.mrb[106].mxu1 }
 0x320   : > { %v3588_v20 = vpop.f32.mrb[101].mxu0  ;;  %v3485_v59 = vpop.f32.mrb[107].mxu1 }
 0x321   : > { %v3589_v14 = vadd.f32 %v3588_v20, %v3587_v2  ;;  %v3590_v43 = vpop.f32.mrb[102].mxu0  ;;  %v1900_v11 = vadd.f32 %v3483_v5, %v5592_v53  ;;  %v3486_v49 = vadd.f32 %v3485_v59, %v3484_v62 }
 0x322   : > { %v3591_v23 = vpop.f32.mrb[103].mxu0 }
 0x323   : > { %v3592_v21 = vadd.f32 %v3591_v23, %v3590_v43  ;;  %v5714_v25 = vadd.f32 %v3589_v14, %v1892_v60  ;;  %v1903_v35 = vadd.f32 %v3486_v49, %v5600_v29 }
 0x325   : > { %v5717_v1 = vadd.f32 %v3592_v21, %v1895_v34  ;;  %v3487_v44 = vpop.f32.mrb[108].mxu1 }
 0x326   : > { %v3488_v4 = vpop.f32.mrb[109].mxu1 }
 0x327   : > { %v3593_v6 = vpop.f32.mrb[104].mxu0  ;;  %v3489_v28 = vadd.f32 %v3488_v4, %v3487_v44  ;;  %v3490_v10 = vpop.f32.mrb[110].mxu1 }
 0x328   : > { %v3594_v16 = vpop.f32.mrb[105].mxu0  ;;  %v3491_v19 = vpop.f32.mrb[111].mxu1 }
 0x329   : > { %v3595_v9 = vadd.f32 %v3594_v16, %v3593_v6  ;;  %v3596_v50 = vpop.f32.mrb[106].mxu0  ;;  %v1908_v53 = vadd.f32 %v3489_v28, %v5604_v32  ;;  %v3492_v57 = vadd.f32 %v3491_v19, %v3490_v10 }
 0x32a   : > { %v3597_v38 = vpop.f32.mrb[107].mxu0 }
 0x32b   : > { %v3598_v52 = vadd.f32 %v3597_v38, %v3596_v50  ;;  %v5720_v63 = vadd.f32 %v3595_v9, %v1900_v11  ;;  %v1911_v29 = vadd.f32 %v3492_v57, %v5612_v56 }
 0x32d   : > { %v5723_v60 = vadd.f32 %v3598_v52, %v1903_v35  ;;  %v3493_v36 = vpop.f32.mrb[112].mxu1 }
 0x32e   : > { %v3494_v24 = vpop.f32.mrb[113].mxu1 }
 0x32f   : > { %v3599_v0 = vpop.f32.mrb[108].mxu0  ;;  %v3495_v34 = vadd.f32 %v3494_v24, %v3493_v36  ;;  %v3496_v15 = vpop.f32.mrb[114].mxu1 }
 0x330   : > { %v3600_v37 = vpop.f32.mrb[109].mxu0  ;;  %v3497_v5 = vpop.f32.mrb[115].mxu1 }
 0x331   : > { %v3601_v2 = vadd.f32 %v3600_v37, %v3599_v0  ;;  %v3602_v62 = vpop.f32.mrb[110].mxu0  ;;  %v1916_v32 = vadd.f32 %v3495_v34, %v5616_v54  ;;  %v3498_v20 = vadd.f32 %v3497_v5, %v3496_v15 }
 0x332   : > { %v3603_v14 = vpop.f32.mrb[111].mxu0 }
 0x333   : > { %v3604_v59 = vadd.f32 %v3603_v14, %v3602_v62  ;;  %v5726_v43 = vadd.f32 %v3601_v2, %v1908_v53  ;;  %v1919_v56 = vadd.f32 %v3498_v20, %v5624_v18 }
 0x335   : > { %v5729_v11 = vadd.f32 %v3604_v59, %v1911_v29  ;;  %v3499_v49 = vpop.f32.mrb[116].mxu1 }
 0x336   : > { %v3500_v23 = vpop.f32.mrb[117].mxu1 }
 0x337   : > { %v3605_v21 = vpop.f32.mrb[112].mxu0  ;;  %v3501_v35 = vadd.f32 %v3500_v23, %v3499_v49  ;;  %v3502_v44 = vpop.f32.mrb[118].mxu1 }
 0x338   : > { %v3606_v4 = vpop.f32.mrb[113].mxu0  ;;  %v3503_v28 = vpop.f32.mrb[119].mxu1 }
 0x339   : > { %v3607_v6 = vadd.f32 %v3606_v4, %v3605_v21  ;;  %v3608_v10 = vpop.f32.mrb[114].mxu0  ;;  %v1924_v54 = vadd.f32 %v3501_v35, %v5628_v46  ;;  %v3504_v16 = vadd.f32 %v3503_v28, %v3502_v44 }
 0x33a   : > { %v3609_v9 = vpop.f32.mrb[115].mxu0 }
 0x33b   : > { %v3610_v19 = vadd.f32 %v3609_v9, %v3608_v10  ;;  %v5732_v50 = vadd.f32 %v3607_v6, %v1916_v32  ;;  %v1927_v18 = vadd.f32 %v3504_v16, %v5636_v40 }
 0x33d   : > { %v5735_v53 = vadd.f32 %v3610_v19, %v1919_v56  ;;  %v3505_v57 = vpop.f32.mrb[120].mxu1 }
 0x33e   : > { %v3506_v38 = vpop.f32.mrb[121].mxu1 }
 0x33f   : > { %v3611_v52 = vpop.f32.mrb[116].mxu0  ;;  %v3507_v29 = vadd.f32 %v3506_v38, %v3505_v57  ;;  %v3508_v36 = vpop.f32.mrb[122].mxu1 }
 0x340   : > { %v3612_v24 = vpop.f32.mrb[117].mxu0  ;;  %v3509_v34 = vpop.f32.mrb[123].mxu1 }
 0x341   : > { %v3613_v0 = vadd.f32 %v3612_v24, %v3611_v52  ;;  %v3614_v15 = vpop.f32.mrb[118].mxu0  ;;  %v1932_v46 = vadd.f32 %v3507_v29, %v5640_v12  ;;  %v3510_v37 = vadd.f32 %v3509_v34, %v3508_v36 }
 0x342   : > { %v3615_v2 = vpop.f32.mrb[119].mxu0 }
 0x343   : > { %v3616_v5 = vadd.f32 %v3615_v2, %v3614_v15  ;;  %v5738_v62 = vadd.f32 %v3613_v0, %v1924_v54  ;;  %v1935_v40 = vadd.f32 %v3510_v37, %v5648_v7 }
 0x345   : > { %v5741_v32 = vadd.f32 %v3616_v5, %v1927_v18  ;;  %v3511_v20 = vpop.f32.mrb[124].mxu1 }
 0x346   : > { %v3512_v14 = vpop.f32.mrb[125].mxu1 }
 0x347   : > { %v3617_v59 = vpop.f32.mrb[120].mxu0  ;;  %v3513_v56 = vadd.f32 %v3512_v14, %v3511_v20  ;;  %v3514_v49 = vpop.f32.mrb[126].mxu1 }
 0x348   : > { %v3618_v23 = vpop.f32.mrb[121].mxu0  ;;  %v3515_v35 = vpop.f32.mrb[127].mxu1 }
 0x349   : > { %v3619_v21 = vadd.f32 %v3618_v23, %v3617_v59  ;;  %v3620_v44 = vpop.f32.mrb[122].mxu0  ;;  %v1940_v12 = vadd.f32 %v3513_v56, %v5652_v17  ;;  %v3516_v4 = vadd.f32 %v3515_v35, %v3514_v49 }
 0x34a   : > { %v3621_v6 = vpop.f32.mrb[123].mxu0 }
 0x34b   : > { %v3622_v28 = vadd.f32 %v3621_v6, %v3620_v44  ;;  %v5744_v10 = vadd.f32 %v3619_v21, %v1932_v46  ;;  %v1943_v7 = vadd.f32 %v3516_v4, %v5655_v48 }
 0x34d   : > { %v5747_v54 = vadd.f32 %v3622_v28, %v1935_v40  ;;  %v3517_v16 = vpop.f32.mrb[128].mxu1 }
 0x34e   : > { %v3518_v9 = vpop.f32.mrb[129].mxu1 }
 0x34f   : > { %v3623_v19 = vpop.f32.mrb[124].mxu0  ;;  %v3519_v18 = vadd.f32 %v3518_v9, %v3517_v16  ;;  %v3520_v57 = vpop.f32.mrb[130].mxu1 }
 0x350   : > { %v3624_v38 = vpop.f32.mrb[125].mxu0  ;;  %v3521_v29 = vpop.f32.mrb[131].mxu1 }
 0x351   : > { %v3625_v52 = vadd.f32 %v3624_v38, %v3623_v19  ;;  %v3626_v36 = vpop.f32.mrb[126].mxu0  ;;  %v1948_v17 = vadd.f32 %v3519_v18, %v5659_v41  ;;  %v3522_v24 = vadd.f32 %v3521_v29, %v3520_v57 }
 0x352   : > { %v3627_v0 = vpop.f32.mrb[127].mxu0 }
 0x353   : > { %v3628_v34 = vadd.f32 %v3627_v0, %v3626_v36  ;;  %v5750_v15 = vadd.f32 %v3625_v52, %v1940_v12  ;;  %v1951_v48 = vadd.f32 %v3522_v24, %v5661_v39 }
 0x355   : > { %v5753_v46 = vadd.f32 %v3628_v34, %v1943_v7  ;;  %v3523_v37 = vpop.f32.mrb[132].mxu1 }
 0x356   : > { %v3524_v2 = vpop.f32.mrb[133].mxu1 }
 0x357   : > { %v3629_v5 = vpop.f32.mrb[128].mxu0  ;;  %v3525_v40 = vadd.f32 %v3524_v2, %v3523_v37  ;;  %v3526_v20 = vpop.f32.mrb[134].mxu1 }
 0x358   : > { %v3630_v14 = vpop.f32.mrb[129].mxu0  ;;  %v3527_v56 = vpop.f32.mrb[135].mxu1 }
 0x359   : > { %v3631_v59 = vadd.f32 %v3630_v14, %v3629_v5  ;;  %v3632_v49 = vpop.f32.mrb[130].mxu0  ;;  %v1956_v41 = vadd.f32 %v3525_v40, %v5665_v45  ;;  %v3528_v23 = vadd.f32 %v3527_v56, %v3526_v20 }
 0x35a   : > { %v3633_v21 = vpop.f32.mrb[131].mxu0 }
 0x35b   : > { %v3634_v35 = vadd.f32 %v3633_v21, %v3632_v49  ;;  %v5756_v44 = vadd.f32 %v3631_v59, %v1948_v17  ;;  %v1959_v39 = vadd.f32 %v3528_v23, %v5667_v27 }
 0x35d   : > { %v5759_v12 = vadd.f32 %v3634_v35, %v1951_v48  ;;  %v3529_v4 = vpop.f32.mrb[136].mxu1 }
 0x35e   : > { %v3530_v6 = vpop.f32.mrb[137].mxu1 }
 0x35f   : > { %v3635_v28 = vpop.f32.mrb[132].mxu0  ;;  %v3531_v7 = vadd.f32 %v3530_v6, %v3529_v4  ;;  %v3532_v16 = vpop.f32.mrb[138].mxu1 }
 0x360   : > { %v3636_v9 = vpop.f32.mrb[133].mxu0  ;;  %v3533_v18 = vpop.f32.mrb[139].mxu1 }
 0x361   : > { %v3637_v19 = vadd.f32 %v3636_v9, %v3635_v28  ;;  %v3638_v57 = vpop.f32.mrb[134].mxu0  ;;  %v1964_v45 = vadd.f32 %v3531_v7, %v5671_v3  ;;  %v3534_v38 = vadd.f32 %v3533_v18, %v3532_v16 }
 0x362   : > { %v3639_v52 = vpop.f32.mrb[135].mxu0 }
 0x363   : > { %v3640_v29 = vadd.f32 %v3639_v52, %v3638_v57  ;;  %v5762_v36 = vadd.f32 %v3637_v19, %v1956_v41  ;;  %v1967_v27 = vadd.f32 %v3534_v38, %v5673_v42 }
 0x365   : > { %v5765_v17 = vadd.f32 %v3640_v29, %v1959_v39  ;;  %v3535_v24 = vpop.f32.mrb[140].mxu1 }
 0x366   : > { %v3536_v0 = vpop.f32.mrb[141].mxu1 }
 0x367   : > { %v3641_v34 = vpop.f32.mrb[136].mxu0  ;;  %v3537_v48 = vadd.f32 %v3536_v0, %v3535_v24  ;;  %v3538_v37 = vpop.f32.mrb[142].mxu1 }
 0x368   : > { %v3642_v2 = vpop.f32.mrb[137].mxu0  ;;  %v3539_v40 = vpop.f32.mrb[143].mxu1 }
 0x369   : > { %v3643_v5 = vadd.f32 %v3642_v2, %v3641_v34  ;;  %v3644_v20 = vpop.f32.mrb[138].mxu0  ;;  %v1972_v3 = vadd.f32 %v3537_v48, %v5678_v13  ;;  %v3540_v14 = vadd.f32 %v3539_v40, %v3538_v37 }
 0x36a   : > { %v3645_v59 = vpop.f32.mrb[139].mxu0 }
 0x36b   : > { %v3646_v56 = vadd.f32 %v3645_v59, %v3644_v20  ;;  %v5768_v49 = vadd.f32 %v3643_v5, %v1964_v45  ;;  %v1975_v42 = vadd.f32 %v3540_v14, %v5681_v61 }
 0x36d   : > { %v5771_v41 = vadd.f32 %v3646_v56, %v1967_v27  ;;  %v3767_v23 = vpop.f32.mrb[144].mxu1 }
 0x36e   : > { %v2182_v21 = vadd.f32 %v3767_v23, %v5690_v47  ;;  %v2173_v39 = vpop.f32.mrb[145].mxu1 }
 0x36f   : > { %v3647_v35 = vpop.f32.mrb[140].mxu0  ;;  %v2174_v4 = vadd.f32 %v2173_v39, %v5684_v51  ;;  %v3768_v28 = vpop.f32.mrb[146].mxu1 }
 0x370   : > { %v3648_v6 = vpop.f32.mrb[141].mxu0  ;;  %v2185_v13 = vadd.f32 %v3768_v28, %v5693_v22  ;;  %v2176_v9 = vpop.f32.mrb[147].mxu1  ;;  %v2302_v61 = vmax.f32 %v2182_v21, 0.0 }
 0x371   : > { %v3649_v7 = vadd.f32 %v3648_v6, %v3647_v35  ;;  %v3650_v16 = vpop.f32.mrb[142].mxu0  ;;  %v2177_v19 = vadd.f32 %v2176_v9, %v5687_v31  ;;  %v2300_v47 = vmax.f32 %v2174_v4, 0.0 }
 0x372   : > { %v3651_v18 = vpop.f32.mrb[143].mxu0  ;;  %v2303_v57 = vmax.f32 %v2185_v13, 0.0 }
 0x373   : > { %v3652_v45 = vadd.f32 %v3651_v18, %v3650_v16  ;;  %v5777_v38 = vadd.f32 %v3649_v7, %v1972_v3  ;;  %v2301_v52 = vmax.f32 %v2177_v19, 0.0 }
 0x374   : > { %v2333_v29 = vpack.c.bf16 %v2303_v57, %v2302_v61 }
 0x375   : > { %v5779_v27 = vadd.f32 %v3652_v45, %v1975_v42  ;;  %v2332_v51 = vpack.c.bf16 %v2301_v52, %v2300_v47  ;;  %v3771_v24 = vpop.f32.mrb[148].mxu1 }
 0x376   : > { %v2198_v0 = vadd.f32 %v3771_v24, %v5702_v26  ;;  %v2189_v22 = vpop.f32.mrb[149].mxu1 }
 0x377   : > { %v2190_v34 = vadd.f32 %v2189_v22, %v5696_v58  ;;  %v3772_v48 = vpop.f32.mrb[150].mxu1  ;;  %3813 = vmatprep.mubr.bf16.mxu0 %v2332_v51 }
 0x378   : > { %v2201_v31 = vadd.f32 %v3772_v48, %v5705_v33  ;;  %v2192_v37 = vpop.f32.mrb[151].mxu1  ;;  %3814 = vmatmul.mubr.bf16.vlgmr.msra.gmra.mrb[144].mxu0 %v2333_v29  ;;  %v2306_v5 = vmax.f32 %v2198_v0, 0.0 }
 0x379   : > { %v2193_v2 = vadd.f32 %v2192_v37, %v5699_v55  ;;  %v2304_v20 = vmax.f32 %v2190_v34, 0.0 }
 0x37a   : > { %v2307_v40 = vmax.f32 %v2201_v31, 0.0 }
 0x37b   : > { %v2305_v3 = vmax.f32 %v2193_v2, 0.0 }
 0x37c   : > { %v2335_v14 = vpack.c.bf16 %v2307_v40, %v2306_v5 }
 0x37d   : > { %v2334_v59 = vpack.c.bf16 %v2305_v3, %v2304_v20  ;;  %v3775_v56 = vpop.f32.mrb[152].mxu1 }
 0x37e   : > { %v2214_v26 = vadd.f32 %v3775_v56, %v5714_v25  ;;  %v2205_v42 = vpop.f32.mrb[153].mxu1 }
 0x37f   : > { %v2206_v58 = vadd.f32 %v2205_v42, %v5708_v8  ;;  %v3776_v23 = vpop.f32.mrb[154].mxu1  ;;  %3817 = vmatprep.mubr.bf16.mxu0 %v2334_v59 }
 0x380   : > { %v2217_v33 = vadd.f32 %v3776_v23, %v5717_v1  ;;  %v2208_v21 = vpop.f32.mrb[155].mxu1  ;;  %3818 = vmatmul.mubr.bf16.gmra.mrb[148].mxu0 %v2335_v14  ;;  %v2310_v35 = vmax.f32 %v2214_v26, 0.0 }
 0x381   : > { %v2209_v55 = vadd.f32 %v2208_v21, %v5711_v30  ;;  %v2308_v4 = vmax.f32 %v2206_v58, 0.0 }
 0x382   : > { %v2311_v39 = vmax.f32 %v2217_v33, 0.0 }
 0x383   : > { %v2309_v6 = vmax.f32 %v2209_v55, 0.0 }
 0x384   : > { %v2337_v28 = vpack.c.bf16 %v2311_v39, %v2310_v35 }
 0x385   : > { %v2336_v7 = vpack.c.bf16 %v2309_v6, %v2308_v4  ;;  %v3779_v13 = vpop.f32.mrb[156].mxu1 }
 0x386   : > { %v2230_v25 = vadd.f32 %v3779_v13, %v5726_v43  ;;  %v2221_v16 = vpop.f32.mrb[157].mxu1 }
 0x387   : > { %v2222_v8 = vadd.f32 %v2221_v16, %v5720_v63  ;;  %v3780_v9 = vpop.f32.mrb[158].mxu1  ;;  %3821 = vmatprep.mubr.bf16.mxu0 %v2336_v7 }
 0x388   : > { %v2233_v1 = vadd.f32 %v3780_v9, %v5729_v11  ;;  %v2224_v19 = vpop.f32.mrb[159].mxu1  ;;  %3822 = vmatmul.mubr.bf16.gmra.mrb[152].mxu0 %v2337_v28  ;;  %v2314_v18 = vmax.f32 %v2230_v25, 0.0 }
 0x389   : > { %v2225_v30 = vadd.f32 %v2224_v19, %v5723_v60  ;;  %v2312_v57 = vmax.f32 %v2222_v8, 0.0 }
 0x38a   : > { %v2315_v61 = vmax.f32 %v2233_v1, 0.0 }
 0x38b   : > { %v2313_v45 = vmax.f32 %v2225_v30, 0.0 }
 0x38c   : > { %v2339_v47 = vpack.c.bf16 %v2315_v61, %v2314_v18 }
 0x38d   : > { %v2338_v52 = vpack.c.bf16 %v2313_v45, %v2312_v57  ;;  %v3783_v29 = vpop.f32.mrb[160].mxu1 }
 0x38e   : > { %v2246_v43 = vadd.f32 %v3783_v29, %v5738_v62  ;;  %v2237_v51 = vpop.f32.mrb[161].mxu1 }
 0x38f   : > { %v2238_v63 = vadd.f32 %v2237_v51, %v5732_v50  ;;  %v3784_v24 = vpop.f32.mrb[162].mxu1  ;;  %3825 = vmatprep.mubr.bf16.mxu0 %v2338_v52  ;;  %v4035_v51 = vld [vmem:[%s4517_s20] sm:$0xff] }
 0x390   : > { %v2249_v11 = vadd.f32 %v3784_v24, %v5741_v32  ;;  %v2240_v0 = vpop.f32.mrb[163].mxu1  ;;  %3826 = vmatmul.mubr.bf16.gmra.mrb[156].mxu0 %v2339_v47  ;;  %v2318_v22 = vmax.f32 %v2246_v43, 0.0  ;;  %v4034_v47 = vld [vmem:[%s4517_s20 + $0x10] sm:$0xff] }
 0x391   : > { %v2241_v60 = vadd.f32 %v2240_v0, %v5735_v53  ;;  %v2316_v48 = vmax.f32 %v2238_v63, 0.0  ;;  %v4036_v0 = vld [vmem:[%s4517_s20 + $0x18] sm:$0xff] }
 0x392   : > { %v2319_v34 = vmax.f32 %v2249_v11, 0.0 }
 0x393   : > { %v2317_v31 = vmax.f32 %v2241_v60, 0.0 }
 0x394   : > { %v2341_v37 = vpack.c.bf16 %v2319_v34, %v2318_v22  ;;  %v4037_v34 = vld [vmem:[%s4517_s20 + $0x8] sm:$0xff] }
 0x395   : > { %v2340_v2 = vpack.c.bf16 %v2317_v31, %v2316_v48  ;;  %v3787_v5 = vpop.f32.mrb[164].mxu1 }
 0x396   : > { %v2262_v62 = vadd.f32 %v3787_v5, %v5750_v15  ;;  %v2253_v40 = vpop.f32.mrb[165].mxu1 }
 0x397   : > { %v2254_v50 = vadd.f32 %v2253_v40, %v5744_v10  ;;  %v3788_v20 = vpop.f32.mrb[166].mxu1  ;;  %3829 = vmatprep.mubr.bf16.mxu0 %v2340_v2 }
 0x398   : > { %v2265_v32 = vadd.f32 %v3788_v20, %v5753_v46  ;;  %v2256_v3 = vpop.f32.mrb[167].mxu1  ;;  %3830 = vmatmul.mubr.bf16.gmra.mrb[160].mxu0 %v2341_v37  ;;  %v2322_v14 = vmax.f32 %v2262_v62, 0.0  ;;  %v4038_v20 = vld [vmem:[%s4517_s20 + $0x30] sm:$0xff] }
 0x399   : > { %v2257_v53 = vadd.f32 %v2256_v3, %v5747_v54  ;;  %v2320_v56 = vmax.f32 %v2254_v50, 0.0 }
 0x39a   : > { %v2323_v59 = vmax.f32 %v2265_v32, 0.0 }
 0x39b   : > { %v2321_v26 = vmax.f32 %v2257_v53, 0.0 }
 0x39c   : > { %v2343_v42 = vpack.c.bf16 %v2323_v59, %v2322_v14  ;;  %v4039_v14 = vld [vmem:[%s4517_s20 + $0x20] sm:$0xff] }
 0x39d   : > { %v2342_v58 = vpack.c.bf16 %v2321_v26, %v2320_v56  ;;  %v3791_v23 = vpop.f32.mrb[168].mxu1 }
 0x39e   : > { %v2278_v15 = vadd.f32 %v3791_v23, %v5762_v36  ;;  %v2269_v33 = vpop.f32.mrb[169].mxu1 }
 0x39f   : > { %v2270_v10 = vadd.f32 %v2269_v33, %v5756_v44  ;;  %v3792_v21 = vpop.f32.mrb[170].mxu1  ;;  %3833 = vmatprep.mubr.bf16.mxu0 %v2342_v58 }
 0x3a0   : > { %v2281_v46 = vadd.f32 %v3792_v21, %v5765_v17  ;;  %v2272_v55 = vpop.f32.mrb[171].mxu1  ;;  %3834 = vmatmul.mubr.bf16.gmra.mrb[164].mxu0 %v2343_v42  ;;  %v2326_v35 = vmax.f32 %v2278_v15, 0.0  ;;  %v4040_v42 = vld [vmem:[%s4517_s20 + $0x38] sm:$0xff]  ;;  %v4041_v15 = vld [vmem:[%s4517_s20 + $0x28] sm:$0xff] }
 0x3a1   : > { %v2273_v54 = vadd.f32 %v2272_v55, %v5759_v12  ;;  %v2324_v4 = vmax.f32 %v2270_v10, 0.0 }
 0x3a2   : > { %v2327_v39 = vmax.f32 %v2281_v46, 0.0 }
 0x3a3   : > { %v2325_v6 = vmax.f32 %v2273_v54, 0.0 }
 0x3a4   : > { %v2345_v28 = vpack.c.bf16 %v2327_v39, %v2326_v35 }
 0x3a5   : > { %v2344_v7 = vpack.c.bf16 %v2325_v6, %v2324_v4  ;;  %v3795_v13 = vpop.f32.mrb[172].mxu1  ;;  %v4042_v4 = vld [vmem:[%s4517_s20 + $0x50] sm:$0xff] }
 0x3a6   : > { %v2294_v36 = vadd.f32 %v3795_v13, %v5777_v38  ;;  %v2285_v25 = vpop.f32.mrb[173].mxu1  ;;  %v4043_v13 = vld [vmem:[%s4517_s20 + $0x40] sm:$0xff] }
 0x3a7   : > { %v2286_v44 = vadd.f32 %v2285_v25, %v5768_v49  ;;  %v3796_v16 = vpop.f32.mrb[174].mxu1  ;;  %3837 = vmatprep.mubr.bf16.mxu0 %v2344_v7  ;;  %v5812_v49 = vld [vmem:[%s5971_s6] ss:$0 sm:$0xff] }
 0x3a8   : > { %v2297_v17 = vadd.f32 %v3796_v16, %v5779_v27  ;;  %v2288_v8 = vpop.f32.mrb[175].mxu1  ;;  %3838 = vmatmul.mubr.bf16.gmra.mrb[168].mxu0 %v2345_v28  ;;  %v2330_v9 = vmax.f32 %v2294_v36, 0.0  ;;  %v4044_v16 = vld [vmem:[%s4517_s20 + $0x58] sm:$0xff] }
 0x3a9   : > { %v2289_v12 = vadd.f32 %v2288_v8, %v5771_v41  ;;  %v2328_v19 = vmax.f32 %v2286_v44, 0.0 }
 0x3aa   : > { %v2331_v1 = vmax.f32 %v2297_v17, 0.0 }
 0x3ab   : > { %v2329_v30 = vmax.f32 %v2289_v12, 0.0  ;;  %v4045_v12 = vld [vmem:[%s4517_s20 + $0x48] sm:$0xff] }
 0x3ac   : > { %v2347_v18 = vpack.c.bf16 %v2331_v1, %v2330_v9 }
 0x3ad   : > { %v2346_v61 = vpack.c.bf16 %v2329_v30, %v2328_v19 }
 0x3af   : > { %3841 = vmatprep.mubr.bf16.mxu0 %v2346_v61 }
 0x3b0   : > { %3842 = vmatmul.mubr.bf16.gmra.mrb[172].mxu0 %v2347_v18 }
 0x44b   : > { %v3815_v38 = vpop.f32.mrb[144].mxu0 }
 0x44c   : > { %v2462_v27 = vadd.f32 %v3815_v38, %v5812_v49  ;;  %v2453_v41 = vpop.f32.mrb[145].mxu0 }
 0x44d   : > { %v2454_v57 = vadd.f32 %v5812_v49, %v2453_v41  ;;  %v3816_v45 = vpop.f32.mrb[146].mxu0  ;;  %v4046_v41 = vld [vmem:[%s4517_s20 + $0x70] sm:$0xff] }
 0x44e   : > { %v2582_v52 = vadd.f32 %v4034_v47, %v2462_v27  ;;  %v2465_v29 = vadd.f32 %v3816_v45, %v5812_v49  ;;  %v2456_v43 = vpop.f32.mrb[147].mxu0 }
 0x44f   : > { %v2580_v63 = vadd.f32 %v4035_v51, %v2454_v57  ;;  %v2457_v24 = vadd.f32 %v5812_v49, %v2456_v43 }
 0x450   : > { %v2614_v11 = vmax.f32 %v2582_v52, 0.0  ;;  %v2583_v60 = vadd.f32 %v4036_v0, %v2465_v29  ;;  %v4047_v52 = vld [vmem:[%s4517_s20 + $0x60] sm:$0xff]  ;;  %v4049_v0 = vld [vmem:[%s4517_s20 + $0x68] sm:$0xff] }
 0x451   : > { %v2612_v22 = vmax.f32 %v2580_v63, 0.0  ;;  %v2581_v48 = vadd.f32 %v4037_v34, %v2457_v24  ;;  %v4048_v63 = vld [vmem:[%s4517_s20 + $0x78] sm:$0xff] }
 0x452   : > { %2646 = vst [vmem:[%s5824_s15 + $0x10] sm:$0xff] %v2614_v11  ;;  %v2615_v31 = vmax.f32 %v2583_v60, 0.0 }
 0x453   : > { %2644 = vst [vmem:[%s5824_s15] sm:$0xff] %v2612_v22  ;;  %v2613_v37 = vmax.f32 %v2581_v48, 0.0  ;;  %v3819_v2 = vpop.f32.mrb[148].mxu0 }
 0x454   : > { %2647 = vst [vmem:[%s5824_s15 + $0x18] sm:$0xff] %v2615_v31  ;;  %v2478_v5 = vadd.f32 %v3819_v2, %v5812_v49  ;;  %v2469_v62 = vpop.f32.mrb[149].mxu0 }
 0x455   : > { %2645 = vst [vmem:[%s5824_s15 + $0x8] sm:$0xff] %v2613_v37  ;;  %v2470_v40 = vadd.f32 %v5812_v49, %v2469_v62  ;;  %v3820_v50 = vpop.f32.mrb[150].mxu0  ;;  %v4050_v62 = vld [vmem:[%s4517_s20 + $0x90] sm:$0xff] }
 0x456   : > { %v2586_v32 = vadd.f32 %v4038_v20, %v2478_v5  ;;  %v2481_v3 = vadd.f32 %v3820_v50, %v5812_v49  ;;  %v2472_v53 = vpop.f32.mrb[151].mxu0 }
 0x457   : > { %v2584_v59 = vadd.f32 %v4039_v14, %v2470_v40  ;;  %v2473_v56 = vadd.f32 %v5812_v49, %v2472_v53 }
 0x458   : > { %v2618_v26 = vmax.f32 %v2586_v32, 0.0  ;;  %v2587_v58 = vadd.f32 %v4040_v42, %v2481_v3  ;;  %v4051_v32 = vld [vmem:[%s4517_s20 + $0x80] sm:$0xff]  ;;  %v4053_v42 = vld [vmem:[%s4517_s20 + $0x88] sm:$0xff] }
 0x459   : > { %v2616_v23 = vmax.f32 %v2584_v59, 0.0  ;;  %v2585_v33 = vadd.f32 %v4041_v15, %v2473_v56  ;;  %v4052_v59 = vld [vmem:[%s4517_s20 + $0x98] sm:$0xff] }
 0x45a   : > { %2650 = vst [vmem:[%s5824_s15 + $0x30] sm:$0xff] %v2618_v26  ;;  %v2619_v10 = vmax.f32 %v2587_v58, 0.0 }
 0x45b   : > { %2648 = vst [vmem:[%s5824_s15 + $0x20] sm:$0xff] %v2616_v23  ;;  %v2617_v21 = vmax.f32 %v2585_v33, 0.0  ;;  %v3823_v46 = vpop.f32.mrb[152].mxu0 }
 0x45c   : > { %2651 = vst [vmem:[%s5824_s15 + $0x38] sm:$0xff] %v2619_v10  ;;  %v2494_v55 = vadd.f32 %v3823_v46, %v5812_v49  ;;  %v2485_v54 = vpop.f32.mrb[153].mxu0 }
 0x45d   : > { %2649 = vst [vmem:[%s5824_s15 + $0x28] sm:$0xff] %v2617_v21  ;;  %v2486_v35 = vadd.f32 %v5812_v49, %v2485_v54  ;;  %v3824_v39 = vpop.f32.mrb[154].mxu0  ;;  %v4054_v54 = vld [vmem:[%s4517_s20 + $0xb0] sm:$0xff] }
 0x45e   : > { %v2590_v6 = vadd.f32 %v4042_v4, %v2494_v55  ;;  %v2497_v28 = vadd.f32 %v3824_v39, %v5812_v49  ;;  %v2488_v7 = vpop.f32.mrb[155].mxu0 }
 0x45f   : > { %v2588_v36 = vadd.f32 %v4043_v13, %v2486_v35  ;;  %v2489_v25 = vadd.f32 %v5812_v49, %v2488_v7 }
 0x460   : > { %v2622_v44 = vmax.f32 %v2590_v6, 0.0  ;;  %v2591_v17 = vadd.f32 %v4044_v16, %v2497_v28  ;;  %v4055_v6 = vld [vmem:[%s4517_s20 + $0xa0] sm:$0xff]  ;;  %v4057_v16 = vld [vmem:[%s4517_s20 + $0xa8] sm:$0xff] }
 0x461   : > { %v2620_v8 = vmax.f32 %v2588_v36, 0.0  ;;  %v2589_v9 = vadd.f32 %v4045_v12, %v2489_v25  ;;  %v4056_v36 = vld [vmem:[%s4517_s20 + $0xb8] sm:$0xff] }
 0x462   : > { %2654 = vst [vmem:[%s5824_s15 + $0x50] sm:$0xff] %v2622_v44  ;;  %v2623_v1 = vmax.f32 %v2591_v17, 0.0 }
 0x463   : > { %2652 = vst [vmem:[%s5824_s15 + $0x40] sm:$0xff] %v2620_v8  ;;  %v2621_v19 = vmax.f32 %v2589_v9, 0.0  ;;  %v3827_v30 = vpop.f32.mrb[156].mxu0 }
 0x464   : > { %2655 = vst [vmem:[%s5824_s15 + $0x58] sm:$0xff] %v2623_v1  ;;  %v2510_v18 = vadd.f32 %v3827_v30, %v5812_v49  ;;  %v2501_v61 = vpop.f32.mrb[157].mxu0 }
 0x465   : > { %2653 = vst [vmem:[%s5824_s15 + $0x48] sm:$0xff] %v2621_v19  ;;  %v2502_v38 = vadd.f32 %v5812_v49, %v2501_v61  ;;  %v3828_v27 = vpop.f32.mrb[158].mxu0  ;;  %v4058_v61 = vld [vmem:[%s4517_s20 + $0xd0] sm:$0xff] }
 0x466   : > { %v2594_v57 = vadd.f32 %v4046_v41, %v2510_v18  ;;  %v2513_v45 = vadd.f32 %v3828_v27, %v5812_v49  ;;  %v2504_v47 = vpop.f32.mrb[159].mxu0 }
 0x467   : > { %v2592_v29 = vadd.f32 %v4047_v52, %v2502_v38  ;;  %v2505_v43 = vadd.f32 %v5812_v49, %v2504_v47 }
 0x468   : > { %v2626_v51 = vmax.f32 %v2594_v57, 0.0  ;;  %v2595_v24 = vadd.f32 %v4048_v63, %v2513_v45  ;;  %v4059_v57 = vld [vmem:[%s4517_s20 + $0xc0] sm:$0xff]  ;;  %v4061_v63 = vld [vmem:[%s4517_s20 + $0xc8] sm:$0xff] }
 0x469   : > { %v2624_v11 = vmax.f32 %v2592_v29, 0.0  ;;  %v2593_v60 = vadd.f32 %v4049_v0, %v2505_v43  ;;  %v4060_v29 = vld [vmem:[%s4517_s20 + $0xd8] sm:$0xff] }
 0x46a   : > { %2658 = vst [vmem:[%s5824_s15 + $0x70] sm:$0xff] %v2626_v51  ;;  %v2627_v22 = vmax.f32 %v2595_v24, 0.0 }
 0x46b   : > { %2656 = vst [vmem:[%s5824_s15 + $0x60] sm:$0xff] %v2624_v11  ;;  %v2625_v34 = vmax.f32 %v2593_v60, 0.0  ;;  %v3831_v48 = vpop.f32.mrb[160].mxu0 }
 0x46c   : > { %2659 = vst [vmem:[%s5824_s15 + $0x78] sm:$0xff] %v2627_v22  ;;  %v2526_v31 = vadd.f32 %v3831_v48, %v5812_v49  ;;  %v2517_v37 = vpop.f32.mrb[161].mxu0 }
 0x46d   : > { %2657 = vst [vmem:[%s5824_s15 + $0x68] sm:$0xff] %v2625_v34  ;;  %v2518_v2 = vadd.f32 %v5812_v49, %v2517_v37  ;;  %v3832_v5 = vpop.f32.mrb[162].mxu0  ;;  %v4062_v37 = vld [vmem:[%s4517_s20 + $0xf0] sm:$0xff] }
 0x46e   : > { %v2598_v40 = vadd.f32 %v4050_v62, %v2526_v31  ;;  %v2529_v50 = vadd.f32 %v3832_v5, %v5812_v49  ;;  %v2520_v20 = vpop.f32.mrb[163].mxu0 }
 0x46f   : > { %v2596_v3 = vadd.f32 %v4051_v32, %v2518_v2  ;;  %v2521_v53 = vadd.f32 %v5812_v49, %v2520_v20 }
 0x470   : > { %v2630_v14 = vmax.f32 %v2598_v40, 0.0  ;;  %v2599_v56 = vadd.f32 %v4052_v59, %v2529_v50  ;;  %v4063_v40 = vld [vmem:[%s4517_s20 + $0xe0] sm:$0xff]  ;;  %v4065_v59 = vld [vmem:[%s4517_s20 + $0xe8] sm:$0xff] }
 0x471   : > { %v2628_v26 = vmax.f32 %v2596_v3, 0.0  ;;  %v2597_v58 = vadd.f32 %v4053_v42, %v2521_v53  ;;  %v4064_v3 = vld [vmem:[%s4517_s20 + $0xf8] sm:$0xff]  ;;  %s4266_s20 = smov [#allocation10]  }
 0x472   : > { %2662 = vst [vmem:[%s5824_s15 + $0x90] sm:$0xff] %v2630_v14  ;;  %v2631_v23 = vmax.f32 %v2599_v56, 0.0  ;;  %s4184_s30 = sshll.u32 %s4266_s20, 4  ;;  %s4185_s30 = int_to_ptr.vmem [resolvable:$false] %s4184_s30 }
 0x473   : > { %2660 = vst [vmem:[%s5824_s15 + $0x80] sm:$0xff] %v2628_v26  ;;  %v2629_v15 = vmax.f32 %v2597_v58, 0.0  ;;  %v3835_v33 = vpop.f32.mrb[164].mxu0  ;;  %s4186_s9 = scalar_lea.vmem %s4185_s30, 8192  ;;  %p4187_p12 = scmp.lt.s32.totalorder %s5918_s12, %s4185_s30 }
 0x474   : > { %2663 = vst [vmem:[%s5824_s15 + $0x98] sm:$0xff] %v2631_v23  ;;  %v2542_v10 = vadd.f32 %v3835_v33, %v5812_v49  ;;  %v2533_v21 = vpop.f32.mrb[165].mxu0  ;;  %p4188_p1 = scmp.lt.s32.totalorder %s4186_s9, %s4180_s13 }
 0x475   : > { %2661 = vst [vmem:[%s5824_s15 + $0x88] sm:$0xff] %v2629_v15  ;;  %v2534_v46 = vadd.f32 %v5812_v49, %v2533_v21  ;;  %v3836_v55 = vpop.f32.mrb[166].mxu0 }
 0x476   : > { %v2602_v35 = vadd.f32 %v4054_v54, %v2542_v10  ;;  %v2545_v39 = vadd.f32 %v3836_v55, %v5812_v49  ;;  %v2536_v4 = vpop.f32.mrb[167].mxu0  ;;  %p4189_p2 = por %p4188_p1, %p4187_p12 }
 0x477   : > { %v2600_v28 = vadd.f32 %v4055_v6, %v2534_v46  ;;  %v2537_v7 = vadd.f32 %v5812_v49, %v2536_v4 }
 0x478   : > { %v2634_v13 = vmax.f32 %v2602_v35, 0.0  ;;  %v2603_v25 = vadd.f32 %v4056_v36, %v2545_v39  ;;  %p4190_p4 = pnand %p4189_p2, %p4183_p7 }
 0x479   : > { %v2632_v44 = vmax.f32 %v2600_v28, 0.0  ;;  %v2601_v17 = vadd.f32 %v4057_v16, %v2537_v7 }
 0x47a   : > { %2666 = vst [vmem:[%s5824_s15 + $0xb0] sm:$0xff] %v2634_v13  ;;  %v2635_v8 = vmax.f32 %v2603_v25, 0.0 }
 0x47b   : > { %2664 = vst [vmem:[%s5824_s15 + $0xa0] sm:$0xff] %v2632_v44  ;;  %v2633_v12 = vmax.f32 %v2601_v17, 0.0  ;;  %v3839_v9 = vpop.f32.mrb[168].mxu0 }
 0x47c   : > { %2667 = vst [vmem:[%s5824_s15 + $0xb8] sm:$0xff] %v2635_v8  ;;  %v2558_v1 = vadd.f32 %v3839_v9, %v5812_v49  ;;  %v2549_v19 = vpop.f32.mrb[169].mxu0 }
 0x47d   : > { %2665 = vst [vmem:[%s5824_s15 + $0xa8] sm:$0xff] %v2633_v12  ;;  %v2550_v30 = vadd.f32 %v5812_v49, %v2549_v19  ;;  %v3840_v18 = vpop.f32.mrb[170].mxu0 }
 0x47e   : > { %v2606_v38 = vadd.f32 %v4058_v61, %v2558_v1  ;;  %v2561_v27 = vadd.f32 %v3840_v18, %v5812_v49  ;;  %v2552_v41 = vpop.f32.mrb[171].mxu0 }
 0x47f   : > { %v2604_v45 = vadd.f32 %v4059_v57, %v2550_v30  ;;  %v2553_v47 = vadd.f32 %v5812_v49, %v2552_v41 }
 0x480   : > { %v2638_v52 = vmax.f32 %v2606_v38, 0.0  ;;  %v2607_v43 = vadd.f32 %v4060_v29, %v2561_v27 }
 0x481   : > { %v2636_v51 = vmax.f32 %v2604_v45, 0.0  ;;  %v2605_v24 = vadd.f32 %v4061_v63, %v2553_v47 }
 0x482   : > { %2670 = vst [vmem:[%s5824_s15 + $0xd0] sm:$0xff] %v2638_v52  ;;  %v2639_v11 = vmax.f32 %v2607_v43, 0.0 }
 0x483   : > { %2668 = vst [vmem:[%s5824_s15 + $0xc0] sm:$0xff] %v2636_v51  ;;  %v2637_v0 = vmax.f32 %v2605_v24, 0.0  ;;  %v3843_v60 = vpop.f32.mrb[172].mxu0 }
 0x484   : > { %2671 = vst [vmem:[%s5824_s15 + $0xd8] sm:$0xff] %v2639_v11  ;;  %v2574_v22 = vadd.f32 %v3843_v60, %v5812_v49  ;;  %v2565_v34 = vpop.f32.mrb[173].mxu0 }
 0x485   : > { %2669 = vst [vmem:[%s5824_s15 + $0xc8] sm:$0xff] %v2637_v0  ;;  %v2566_v48 = vadd.f32 %v5812_v49, %v2565_v34  ;;  %v3844_v31 = vpop.f32.mrb[174].mxu0 }
 0x486   : > { %v2610_v2 = vadd.f32 %v4062_v37, %v2574_v22  ;;  %v2577_v5 = vadd.f32 %v3844_v31, %v5812_v49  ;;  %v2568_v62 = vpop.f32.mrb[175].mxu0 }
 0x487   : > { %v2608_v50 = vadd.f32 %v4063_v40, %v2566_v48  ;;  %v2569_v20 = vadd.f32 %v5812_v49, %v2568_v62 }
 0x488   : > { %v2642_v32 = vmax.f32 %v2610_v2, 0.0  ;;  %v2611_v53 = vadd.f32 %v4064_v3, %v2577_v5 }
 0x489   : > { %v2640_v14 = vmax.f32 %v2608_v50, 0.0  ;;  %v2609_v56 = vadd.f32 %v4065_v59, %v2569_v20 }
 0x48a   : > { %2674 = vst [vmem:[%s5824_s15 + $0xf0] sm:$0xff] %v2642_v32  ;;  %v2643_v26 = vmax.f32 %v2611_v53, 0.0 }
 0x48b   : > { %2672 = vst [vmem:[%s5824_s15 + $0xe0] sm:$0xff] %v2640_v14  ;;  %v2641_v49 = vmax.f32 %v2609_v56, 0.0 }
 0x48c   : > { %2675 = vst [vmem:[%s5824_s15 + $0xf8] sm:$0xff] %v2643_v26 }
 0x48d   : > { %2673 = vst [vmem:[%s5824_s15 + $0xe8] sm:$0xff] %v2641_v49 }
 0x48e   : > { %4193 = shalt.err (!%p4190_p4)
}
 0x48f   : > { %s4194_s23 = scalar_lea.hbm %s5916_s16, 4096  ;;  %s4198_s14 = scalar_lea.hbm %s5972_s7, 8192 }
 0x490   : > { %p4195_p9 = scmp.ne.s32.totalorder %s5916_s16, %s4194_s23  ;;  %p4199_p8 = scmp.lt.u32.totalorder %s5916_s16, %s5972_s7 }
 0x491   : > { %p4200_p13 = scmp.lt.u32.totalorder %s4198_s14, %s4194_s23  ;;  %p4202_p10 = scmp.lt.u32.totalorder %s4194_s23, %s5916_s16 }
 0x492   : > { %p4196_p0 = pnand %p4195_p9, %p4463_p5 }
 0x493   : > { %p4201_p6 = por %p4200_p13, %p4199_p8 }
 0x494   : > { %p4197_p11 = pneg %p4196_p0 }
 0x495   : > { %p4203_p3 = por %p4202_p10, %p4201_p6 }
 0x497   : > { %p4204_p7 = pnand %p4203_p3, %p4197_p11 }
 0x499   : > { %4207 = shalt.err (!%p4204_p7)
}
 0x49a   : > { %s4267_s8 = smov 128   ;;  %s4268_s17 = smov 8  }
 0x49b   : > { %3875 = dma.vmem_to_hbm [thread:$0]  (%p4463_p5), %s5918_s12, 4096, %s5916_s16, %s2677_s28, %s4267_s8, %s4267_s8, %s4268_s17  }
 0x49c PF: > { %s6108_s13 = sld [smem:[#allocation15_spill]]  ;;  %s2705_s20 = sand.u32 1, %s4242_s24  }
 0x49d   : > { %p6110_p1 = scmp.ge.s32.totalorder %s4254_s27, 2  ;;  %s2706_s30 = scalar_lea.sflag [#allocation4], %s2705_s20 }
 0x4a2   : > { %p6109_p12 = scmp.ne.s32.totalorder %s6108_s13, 0 }
 0x4a4   : > { %p3892_p2 = pnand %p6110_p1, %p6109_p12 }
 0x4a6   : > { %4237 = dma.done.wait (!%p3892_p2), %s2706_s30, 4096  }
 0x4a7   : > { %4239 = vsyncadd (!%p3892_p2), %s2706_s30, 4294963200  ;;  %p22_p4 = scmp.ge.s32.totalorder %s4449_s22, 4   ;;  %s6111_s24 = smov %s4246_s25 }
 0x4a8   : > { %s6112_s25 = smov %s4250_s26  ;;  %s6113_s26 = smov %s4459_s18 }
 0x4a9   : > { %s6114_s27 = smov %s4449_s22  ;;  %24 = sbr.rel (!%p22_p4) target bundleno = 7 (0x7), region = 105 }
 0x4b0   :  { %2711 = vsyncpa [#allocation3], 1 }
 0x4b1   :  { %2713 = vsyncpa [#allocation3 + $0x1], 1 }
 0x4b2   :  { %2714 = vsyncpa [#allocation6], 1 }
 0x4b3   :  { %2715 = vsyncpa [#allocation9], 1 }
 0x4b4   :  { %2716 = vsyncpa [#allocation4], 1 }
 0x4b5   :  { %2718 = vsyncpa [#allocation4 + $0x1], 1 }

</bundles_post_ra>
